<compile_context>
chip_gen: v7x
topology: tpu7x:2x2x1
jax: 0.10.0
libtpu: 0.0.40
codegen_flags: <defaults>
</compile_context>

<pallas_src>
import functools
import math

import jax
import jax.numpy as jnp
import numpy as np
from jax.experimental import pallas as pl
from jax.experimental.pallas import tpu as pltpu

# ---------------------------------------------------------------------------
# Config (small synthetic shapes consistent with the module's forward)
# ---------------------------------------------------------------------------
N = 2              # batch
N_OBJS = 8         # number of object queries
L = 16             # encoder token sequence length
C = 32             # embed_dim
H = 4              # n_heads
DH = C // H        # head dim
FFN_HIDDEN = 4 * C
EPS = 1e-5

SCAL_W = max(3 * C, FFN_HIDDEN, 128)   # lane width of the packed scalar slab


# ---------------------------------------------------------------------------
# Pallas kernel: full decoder layer for `nb` batch elements per grid step
# ---------------------------------------------------------------------------
def detr_decoder_layer_kernel(
    cq_ref,        # (nb*n_objs, C) f32   content queries
    oq_ref,        # (nb*n_objs, C) f32   object queries (positional)
    xk_ref,        # (nb*L, C)     f32   x + x_pe  (cross-attn K input)
    xv_ref,        # (nb*L, C)     f32   x         (cross-attn V input)
    attn_w_ref,    # (2, C, 4C)    bf16  [Wq|Wk|Wv|Wo]; row 0 = self, 1 = cross
    scal_ref,      # (12, SCAL_W)  f32   packed biases / LN params (see pack_params)
    w1_ref,        # (C, 4C)       bf16  FFN first linear
    w2_ref,        # (4C, C)       bf16  FFN second linear
    out_ref,       # (nb*n_objs, C) f32
    *, nb,
):
    f32 = jnp.float32
    bf16 = jnp.bfloat16
    c = cq_ref.shape[1]
    n_objs = cq_ref.shape[0] // nb
    l = xk_ref.shape[0] // nb
    ffn = w1_ref.shape[1]
    scale = 1.0 / math.sqrt(DH)

    # ----- activations (already flat 2-D, f32) -----
    cq = cq_ref[...]
    oq = oq_ref[...]
    xk = xk_ref[...]
    xv = xv_ref[...]

    # ----- parameters -----
    sa_w = attn_w_ref[0]                       # (C, 4C) bf16
    ca_w = attn_w_ref[1]
    scal = scal_ref[...]                       # (12, SCAL_W) f32
    sa_b = scal[0:1, :3 * c]                   # (1, 3C)  fused q|k|v bias (self)
    ca_b = scal[1:2, :3 * c]                   #          fused q|k|v bias (cross)
    vec = scal[2:11, :c]                       # (9, C):  [sa_bo, ca_bo, ffn_b2,
                                               #  ln1_g, ln1_b, ln2_g, ln2_b, ln3_g, ln3_b]
    b1 = scal[11:12, :ffn]                     # (1, 4C)
    w1 = w1_ref[...]                           # bf16
    w2 = w2_ref[...]                           # bf16

    def layer_norm(v, g, b):
        mu = jnp.mean(v, axis=-1, keepdims=True)
        var = jnp.mean((v - mu) ** 2, axis=-1, keepdims=True)
        return (v - mu) * jax.lax.rsqrt(var + EPS) * g + b

    def split_heads(t2, t):
        # (nb*t, C) f32 -> (H*nb, t, DH) f32, leading index = h*nb + b.
        th = jnp.stack([t2[:, h * DH:(h + 1) * DH] for h in range(H)], axis=0)
        return th.reshape(H * nb, t, DH)

    def mha(q_in, k_in, v_in, tq, tk, w, b_qkv, bo, fuse_qk):
        # --- projections: bf16 operands, f32 accumulation / bias / scale ---
        if fuse_qk:   # self-attention: q_in == k_in, fuse the Q|K matmul
            qk = jnp.dot(q_in.astype(bf16), w[:, :2 * c],
                         preferred_element_type=f32) + b_qkv[:, :2 * c]
            q = qk[:, :c] * scale
            k = qk[:, c:2 * c]
        else:
            q = (jnp.dot(q_in.astype(bf16), w[:, :c],
                         preferred_element_type=f32) + b_qkv[:, :c]) * scale
            k = jnp.dot(k_in.astype(bf16), w[:, c:2 * c],
                        preferred_element_type=f32) + b_qkv[:, c:2 * c]
        v = jnp.dot(v_in.astype(bf16), w[:, 2 * c:3 * c],
                    preferred_element_type=f32) + b_qkv[:, 2 * c:3 * c]

        # --- single batched attention over H*nb (no per-batch Python loop) ---
        qh = split_heads(q, tq)                    # (H*nb, tq, DH)
        kh = split_heads(k, tk)                    # (H*nb, tk, DH)
        vh = split_heads(v, tk)

        s = jax.lax.dot_general(                    # (H*nb, tq, tk) f32
            qh.astype(bf16), kh.astype(bf16),
            (((2,), (2,)), ((0,), (0,))),
            preferred_element_type=f32)
        s = s - jnp.max(s, axis=-1, keepdims=True)
        p = jnp.exp(s)
        p = p * pl.reciprocal(jnp.sum(p, axis=-1, keepdims=True), approx=True)

        ctx = jax.lax.dot_general(                  # (H*nb, tq, DH) f32
            p.astype(bf16), vh.astype(bf16),
            (((2,), (1,)), ((0,), (0,))),
            preferred_element_type=f32)

        # --- merge heads, single (rows, C) x (C, C) output projection ---
        merged = jnp.concatenate(
            [ctx[h * nb:(h + 1) * nb].reshape(nb * tq, DH) for h in range(H)],
            axis=1)                                 # (nb*tq, C) f32
        out = jnp.dot(merged.astype(bf16), w[:, 3 * c:],
                      preferred_element_type=f32) + bo
        return out

    # ----- self-attention block -----
    sa_in = cq + oq
    attn = mha(sa_in, sa_in, cq, n_objs, n_objs, sa_w, sa_b, vec[0:1],
               fuse_qk=True)
    cq1 = layer_norm(cq + attn, vec[3:4], vec[4:5])

    # ----- cross-attention block -----
    attn = mha(cq1 + oq, xk, xv, n_objs, l, ca_w, ca_b, vec[1:2],
               fuse_qk=False)
    cq2 = layer_norm(cq1 + attn, vec[5:6], vec[6:7])

    # ----- FFN block -----
    hid = jnp.maximum(
        jnp.dot(cq2.astype(bf16), w1, preferred_element_type=f32) + b1, 0.0)
    ff = jnp.dot(hid.astype(bf16), w2, preferred_element_type=f32) + vec[2:3]
    out = layer_norm(cq2 + ff, vec[7:8], vec[8:9])

    out_ref[...] = out.astype(out_ref.dtype)


# ---------------------------------------------------------------------------
# Wrapper
# ---------------------------------------------------------------------------
def detr_decoder_layer(con_query, x, x_pe, object_query, packed,
                       *, batch_per_step=None):
    n, n_objs, c = con_query.shape
    l = x.shape[1]
    # Default: whole batch in one grid step (lowest per-step overhead on the
    # single-TC v5e/v6e).  On v7x, if profiling shows the megacore split wins,
    # pass batch_per_step = max(1, n // 2) so each TensorCore gets ONE big step
    # rather than one step per batch element.
    nb = n if batch_per_step is None else batch_per_step
    assert n % nb == 0
    grid = (n // nb,)

    # Flatten / pre-add in XLA (free) so the kernel only sees 2-D slabs.
    cq2d = con_query.reshape(n * n_objs, c)
    oq2d = object_query.reshape(n * n_objs, c)
    xk2d = (x + x_pe).reshape(n * l, c)     # cross-attn K input (x + positional)
    xv2d = x.reshape(n * l, c)              # cross-attn V input

    def full(a):
        nd = a.ndim
        return pl.BlockSpec(tuple(a.shape), lambda i: (0,) * nd)

    in_specs = [
        pl.BlockSpec((nb * n_objs, c), lambda i: (i, 0)),   # cq2d
        pl.BlockSpec((nb * n_objs, c), lambda i: (i, 0)),   # oq2d
        pl.BlockSpec((nb * l, c), lambda i: (i, 0)),        # xk2d
        pl.BlockSpec((nb * l, c), lambda i: (i, 0)),        # xv2d
        full(packed["attn_w"]),
        full(packed["scal"]),
        full(packed["w1"]),
        full(packed["w2"]),
    ]
    out_specs = pl.BlockSpec((nb * n_objs, c), lambda i: (i, 0))

    out2d = pl.pallas_call(
        functools.partial(detr_decoder_layer_kernel, nb=nb),
        out_shape=jax.ShapeDtypeStruct((n * n_objs, c), jnp.float32),
        grid_spec=pltpu.PrefetchScalarGridSpec(
            num_scalar_prefetch=0,
            grid=grid,
            in_specs=in_specs,
            out_specs=out_specs,
        ),
        compiler_params=pltpu.CompilerParams(
            dimension_semantics=("parallel",)),
    )(cq2d, oq2d, xk2d, xv2d,
      packed["attn_w"], packed["scal"], packed["w1"], packed["w2"])
    return out2d.reshape(n, n_objs, c)


# ---------------------------------------------------------------------------
# Parameter packing: 4 slabs total, bf16 matrix weights, one f32 scalar slab
# ---------------------------------------------------------------------------
def pack_params(raw):
    bf16 = jnp.bfloat16

    def wslab(w):                        # (4, C, C) -> (C, 4C) = [Wq|Wk|Wv|Wo]
        return jnp.concatenate([w[0], w[1], w[2], w[3]], axis=1)

    attn_w = jnp.stack([wslab(raw["sa_w"]),
                        wslab(raw["ca_w"])]).astype(bf16)      # (2, C, 4C)

    def pad_row(v):                      # (k,) -> (1, SCAL_W)
        v = jnp.asarray(v, jnp.float32).reshape(1, -1)
        return jnp.pad(v, ((0, 0), (0, SCAL_W - v.shape[1])))

    scal = jnp.concatenate([
        pad_row(jnp.concatenate([raw["sa_b"][0], raw["sa_b"][1], raw["sa_b"][2]])),
        pad_row(jnp.concatenate([raw["ca_b"][0], raw["ca_b"][1], raw["ca_b"][2]])),
        pad_row(raw["sa_b"][3]),          # self-attn output-proj bias
        pad_row(raw["ca_b"][3]),          # cross-attn output-proj bias
        pad_row(raw["b2"][0]),            # FFN second-linear bias
        pad_row(raw["ln_w"][0]), pad_row(raw["ln_b"][0]),
        pad_row(raw["ln_w"][1]), pad_row(raw["ln_b"][1]),
        pad_row(raw["ln_w"][2]), pad_row(raw["ln_b"][2]),
        pad_row(raw["b1"][0]),            # FFN first-linear bias
    ], axis=0)                                                  # (12, SCAL_W)

    return {"attn_w": attn_w, "scal": scal,
            "w1": raw["w1"].astype(bf16), "w2": raw["w2"].astype(bf16)}


# ---------------------------------------------------------------------------
# Pure-JAX reference mirroring the kernel's precision contract
# (bf16 matmul operands / f32 accumulation & elementwise, exact softmax).
# ---------------------------------------------------------------------------
def _r(t):
    return jnp.asarray(t, jnp.float32).astype(jnp.bfloat16).astype(jnp.float32)


def reference(con_query, x, x_pe, object_query, p):
    scale = 1.0 / math.sqrt(DH)

    def mha(q_in, k_in, v_in, w, b):
        wq, wk, wv, wo = (_r(w[i]) for i in range(4))
        q = (_r(q_in) @ wq + b[0]) * scale
        k = _r(k_in) @ wk + b[1]
        v = _r(v_in) @ wv + b[2]
        B, Tq, _ = q.shape
        Tk = k.shape[1]
        qh = _r(q).reshape(B, Tq, H, DH).transpose(0, 2, 1, 3)
        kh = _r(k).reshape(B, Tk, H, DH).transpose(0, 2, 1, 3)
        vh = _r(v).reshape(B, Tk, H, DH).transpose(0, 2, 1, 3)
        s = jnp.einsum("bhqd,bhkd->bhqk", qh, kh)
        pr = jax.nn.softmax(s, axis=-1)
        o = jnp.einsum("bhqk,bhkd->bhqd", _r(pr), vh)
        o = o.transpose(0, 2, 1, 3).reshape(B, Tq, C)
        return _r(o) @ wo + b[3]

    def ln(v, g, b):
        mu = v.mean(-1, keepdims=True)
        var = ((v - mu) ** 2).mean(-1, keepdims=True)
        return (v - mu) * jax.lax.rsqrt(var + EPS) * g + b

    cq, oq = con_query, object_query
    qk = cq + oq
    cq = ln(cq + mha(qk, qk, con_query, p["sa_w"], p["sa_b"]),
            p["ln_w"][0], p["ln_b"][0])
    cq = ln(cq + mha(cq + oq, x + x_pe, x, p["ca_w"], p["ca_b"]),
            p["ln_w"][1], p["ln_b"][1])
    hid = jnp.maximum(_r(cq) @ _r(p["w1"]) + p["b1"][0], 0.0)
    ff = _r(hid) @ _r(p["w2"]) + p["b2"][0]
    return ln(cq + ff, p["ln_w"][2], p["ln_b"][2])


# ---------------------------------------------------------------------------
# Main
# ---------------------------------------------------------------------------
if __name__ == "__main__":
    key = jax.random.PRNGKey(0)
    keys = jax.random.split(key, 12)

    con_query = jax.random.normal(keys[0], (N, N_OBJS, C), jnp.float32)
    x = jax.random.normal(keys[1], (N, L, C), jnp.float32)
    x_pe = jax.random.normal(keys[2], (1, L, C), jnp.float32)
    object_query = jax.random.normal(keys[3], (N, N_OBJS, C), jnp.float32)

    w_scale = 0.05
    raw = {
        "sa_w": w_scale * jax.random.normal(keys[4], (4, C, C), jnp.float32),
        "sa_b": 0.01 * jax.random.normal(keys[5], (4, C), jnp.float32),
        "ca_w": w_scale * jax.random.normal(keys[6], (4, C, C), jnp.float32),
        "ca_b": 0.01 * jax.random.normal(keys[7], (4, C), jnp.float32),
        "ln_w": jnp.ones((3, C), jnp.float32),
        "ln_b": jnp.zeros((3, C), jnp.float32),
        "w1": w_scale * jax.random.normal(keys[8], (C, FFN_HIDDEN), jnp.float32),
        "b1": 0.01 * jax.random.normal(keys[9], (1, FFN_HIDDEN), jnp.float32),
        "w2": w_scale * jax.random.normal(keys[10], (FFN_HIDDEN, C), jnp.float32),
        "b2": 0.01 * jax.random.normal(keys[11], (1, C), jnp.float32),
    }
    packed = pack_params(raw)

    # The reference applies the same bf16 rounding at every matmul operand as
    # the kernel, so the remaining deltas are the approx softmax reciprocal
    # and accumulation order (hence the 5e-3 tolerance).
    ref = reference(con_query, x, x_pe, object_query, raw)

    # Default path: whole batch in one grid step (v5e / v6e single-TC path).
    out = jax.block_until_ready(
        detr_decoder_layer(con_query, x, x_pe, object_query, packed))
    np.testing.assert_allclose(np.asarray(out), np.asarray(ref),
                               rtol=5e-3, atol=5e-3)
    assert out.shape == (N, N_OBJS, C)

    # Megacore-style variant: grid=(N,) "parallel" so v7x's two TensorCores
    # can split the batch (exercises the multi-step BlockSpec path).
    out2 = jax.block_until_ready(
        detr_decoder_layer(con_query, x, x_pe, object_query, packed,
                           batch_per_step=1))
    np.testing.assert_allclose(np.asarray(out2), np.asarray(ref),
                               rtol=5e-3, atol=5e-3)

    print("KERNEL_OK")
</pallas_src>

<mosaic_0001>
module attributes {stable_mosaic.version = 11 : i64} {
  func.func @detr_decoder_layer_kernel(%arg0: i32, %arg1: memref<16x32xf32, #tpu.memory_space<vmem>>, %arg2: memref<16x32xf32, #tpu.memory_space<vmem>>, %arg3: memref<32x32xf32, #tpu.memory_space<vmem>>, %arg4: memref<32x32xf32, #tpu.memory_space<vmem>>, %arg5: memref<2x32x128xbf16, #tpu.memory_space<vmem>>, %arg6: memref<12x128xf32, #tpu.memory_space<vmem>>, %arg7: memref<32x128xbf16, #tpu.memory_space<vmem>>, %arg8: memref<128x32xbf16, #tpu.memory_space<vmem>>, %arg9: memref<16x32xf32, #tpu.memory_space<vmem>>) attributes {dimension_semantics = [#tpu.dimension_semantics<parallel>], iteration_bounds = array<i64: 1>, scalar_prefetch = 0 : i64, scratch_operands = 0 : i64, tpu.core_type = #tpu.core_type<tc>, window_params = [{transform_indices = @transform_0, window_bounds = array<i64: 16, 32>}, {transform_indices = @transform_1, window_bounds = array<i64: 16, 32>}, {transform_indices = @transform_2, window_bounds = array<i64: 32, 32>}, {transform_indices = @transform_3, window_bounds = array<i64: 32, 32>}, {pipeline_mode = #tpu.pipeline_mode<synchronous>, transform_indices = @transform_4, window_bounds = array<i64: 2, 32, 128>}, {pipeline_mode = #tpu.pipeline_mode<synchronous>, transform_indices = @transform_5, window_bounds = array<i64: 12, 128>}, {pipeline_mode = #tpu.pipeline_mode<synchronous>, transform_indices = @transform_6, window_bounds = array<i64: 32, 128>}, {pipeline_mode = #tpu.pipeline_mode<synchronous>, transform_indices = @transform_7, window_bounds = array<i64: 128, 32>}, {transform_indices = @transform_8, window_bounds = array<i64: 16, 32>}]} {
    %c0 = arith.constant 0 : index
    %c0_0 = arith.constant 0 : index
    %0 = vector.load %arg1[%c0, %c0_0] : memref<16x32xf32, #tpu.memory_space<vmem>>, vector<16x32xf32>
    %c0_1 = arith.constant 0 : index
    %c0_2 = arith.constant 0 : index
    %1 = vector.load %arg2[%c0_1, %c0_2] : memref<16x32xf32, #tpu.memory_space<vmem>>, vector<16x32xf32>
    %c0_3 = arith.constant 0 : index
    %c0_4 = arith.constant 0 : index
    %2 = vector.load %arg3[%c0_3, %c0_4] : memref<32x32xf32, #tpu.memory_space<vmem>>, vector<32x32xf32>
    %c0_5 = arith.constant 0 : index
    %c0_6 = arith.constant 0 : index
    %3 = vector.load %arg4[%c0_5, %c0_6] : memref<32x32xf32, #tpu.memory_space<vmem>>, vector<32x32xf32>
    %c0_7 = arith.constant 0 : index
    %c0_8 = arith.constant 0 : index
    %c0_9 = arith.constant 0 : index
    %4 = vector.load %arg5[%c0_7, %c0_8, %c0_9] : memref<2x32x128xbf16, #tpu.memory_space<vmem>>, vector<1x32x128xbf16>
    %5 = vector.shape_cast %4 : vector<1x32x128xbf16> to vector<32x128xbf16>
    %c1 = arith.constant 1 : index
    %c0_10 = arith.constant 0 : index
    %c0_11 = arith.constant 0 : index
    %6 = vector.load %arg5[%c1, %c0_10, %c0_11] : memref<2x32x128xbf16, #tpu.memory_space<vmem>>, vector<1x32x128xbf16>
    %7 = vector.shape_cast %6 : vector<1x32x128xbf16> to vector<32x128xbf16>
    %c0_12 = arith.constant 0 : index
    %c0_13 = arith.constant 0 : index
    %8 = vector.load %arg6[%c0_12, %c0_13] : memref<12x128xf32, #tpu.memory_space<vmem>>, vector<12x128xf32>
    %9 = vector.extract_strided_slice %8 {offsets = [0, 0], sizes = [1, 96], strides = [1, 1]} : vector<12x128xf32> to vector<1x96xf32>
    %10 = vector.extract_strided_slice %8 {offsets = [1, 0], sizes = [1, 96], strides = [1, 1]} : vector<12x128xf32> to vector<1x96xf32>
    %11 = vector.extract_strided_slice %8 {offsets = [2, 0], sizes = [9, 32], strides = [1, 1]} : vector<12x128xf32> to vector<9x32xf32>
    %12 = vector.extract_strided_slice %8 {offsets = [11, 0], sizes = [1, 128], strides = [1, 1]} : vector<12x128xf32> to vector<1x128xf32>
    %c0_14 = arith.constant 0 : index
    %c0_15 = arith.constant 0 : index
    %13 = vector.load %arg7[%c0_14, %c0_15] : memref<32x128xbf16, #tpu.memory_space<vmem>>, vector<32x128xbf16>
    %c0_16 = arith.constant 0 : index
    %c0_17 = arith.constant 0 : index
    %14 = vector.load %arg8[%c0_16, %c0_17] : memref<128x32xbf16, #tpu.memory_space<vmem>>, vector<128x32xbf16>
    %15 = arith.addf %0, %1 : vector<16x32xf32>
    %16 = vector.extract_strided_slice %11 {offsets = [0, 0], sizes = [1, 32], strides = [1, 1]} : vector<9x32xf32> to vector<1x32xf32>
    %17 = arith.truncf %15 : vector<16x32xf32> to vector<16x32xbf16>
    %18 = vector.extract_strided_slice %5 {offsets = [0, 0], sizes = [32, 64], strides = [1, 1]} : vector<32x128xbf16> to vector<32x64xbf16>
    %cst = arith.constant dense<0.000000e+00> : vector<16x64xf32>
    %19 = tpu.matmul %17, %18, %cst {dimension_numbers = #tpu.dot_dimension_numbers<[1], [0], [0], [1], [0, 0, 1, 1], [], []>} : vector<16x32xbf16>, vector<32x64xbf16>, vector<16x64xf32> -> vector<16x64xf32>
    %20 = vector.extract_strided_slice %9 {offsets = [0, 0], sizes = [1, 64], strides = [1, 1]} : vector<1x96xf32> to vector<1x64xf32>
    %21 = vector.broadcast %20 : vector<1x64xf32> to vector<16x64xf32>
    %22 = arith.addf %19, %21 : vector<16x64xf32>
    %23 = vector.extract_strided_slice %22 {offsets = [0, 0], sizes = [16, 32], strides = [1, 1]} : vector<16x64xf32> to vector<16x32xf32>
    %cst_18 = arith.constant 0.353553385 : f32
    %24 = vector.broadcast %cst_18 : f32 to vector<16x32xf32>
    %25 = arith.mulf %23, %24 : vector<16x32xf32>
    %26 = vector.extract_strided_slice %22 {offsets = [0, 32], sizes = [16, 32], strides = [1, 1]} : vector<16x64xf32> to vector<16x32xf32>
    %27 = arith.truncf %0 : vector<16x32xf32> to vector<16x32xbf16>
    %28 = vector.extract_strided_slice %5 {offsets = [0, 64], sizes = [32, 32], strides = [1, 1]} : vector<32x128xbf16> to vector<32x32xbf16>
    %cst_19 = arith.constant dense<0.000000e+00> : vector<16x32xf32>
    %29 = tpu.matmul %27, %28, %cst_19 {dimension_numbers = #tpu.dot_dimension_numbers<[1], [0], [0], [1], [0, 0, 1, 1], [], []>} : vector<16x32xbf16>, vector<32x32xbf16>, vector<16x32xf32> -> vector<16x32xf32>
    %30 = vector.extract_strided_slice %9 {offsets = [0, 64], sizes = [1, 32], strides = [1, 1]} : vector<1x96xf32> to vector<1x32xf32>
    %31 = vector.broadcast %30 : vector<1x32xf32> to vector<16x32xf32>
    %32 = arith.addf %29, %31 : vector<16x32xf32>
    %33 = vector.extract_strided_slice %25 {offsets = [0, 0], sizes = [16, 8], strides = [1, 1]} : vector<16x32xf32> to vector<16x8xf32>
    %34 = vector.extract_strided_slice %25 {offsets = [0, 8], sizes = [16, 8], strides = [1, 1]} : vector<16x32xf32> to vector<16x8xf32>
    %35 = vector.extract_strided_slice %25 {offsets = [0, 16], sizes = [16, 8], strides = [1, 1]} : vector<16x32xf32> to vector<16x8xf32>
    %36 = vector.extract_strided_slice %25 {offsets = [0, 24], sizes = [16, 8], strides = [1, 1]} : vector<16x32xf32> to vector<16x8xf32>
    %37 = vector.shape_cast %33 : vector<16x8xf32> to vector<1x16x8xf32>
    %38 = vector.shape_cast %34 : vector<16x8xf32> to vector<1x16x8xf32>
    %39 = vector.shape_cast %35 : vector<16x8xf32> to vector<1x16x8xf32>
    %40 = vector.shape_cast %36 : vector<16x8xf32> to vector<1x16x8xf32>
    %41 = tpu.concatenate %37, %38, %39, %40 in 0 : vector<1x16x8xf32>, vector<1x16x8xf32>, vector<1x16x8xf32>, vector<1x16x8xf32> -> vector<4x16x8xf32>
    %42 = vector.shape_cast %41 : vector<4x16x8xf32> to vector<8x8x8xf32>
    %43 = vector.extract_strided_slice %26 {offsets = [0, 0], sizes = [16, 8], strides = [1, 1]} : vector<16x32xf32> to vector<16x8xf32>
    %44 = vector.extract_strided_slice %26 {offsets = [0, 8], sizes = [16, 8], strides = [1, 1]} : vector<16x32xf32> to vector<16x8xf32>
    %45 = vector.extract_strided_slice %26 {offsets = [0, 16], sizes = [16, 8], strides = [1, 1]} : vector<16x32xf32> to vector<16x8xf32>
    %46 = vector.extract_strided_slice %26 {offsets = [0, 24], sizes = [16, 8], strides = [1, 1]} : vector<16x32xf32> to vector<16x8xf32>
    %47 = vector.shape_cast %43 : vector<16x8xf32> to vector<1x16x8xf32>
    %48 = vector.shape_cast %44 : vector<16x8xf32> to vector<1x16x8xf32>
    %49 = vector.shape_cast %45 : vector<16x8xf32> to vector<1x16x8xf32>
    %50 = vector.shape_cast %46 : vector<16x8xf32> to vector<1x16x8xf32>
    %51 = tpu.concatenate %47, %48, %49, %50 in 0 : vector<1x16x8xf32>, vector<1x16x8xf32>, vector<1x16x8xf32>, vector<1x16x8xf32> -> vector<4x16x8xf32>
    %52 = vector.shape_cast %51 : vector<4x16x8xf32> to vector<8x8x8xf32>
    %53 = vector.extract_strided_slice %32 {offsets = [0, 0], sizes = [16, 8], strides = [1, 1]} : vector<16x32xf32> to vector<16x8xf32>
    %54 = vector.extract_strided_slice %32 {offsets = [0, 8], sizes = [16, 8], strides = [1, 1]} : vector<16x32xf32> to vector<16x8xf32>
    %55 = vector.extract_strided_slice %32 {offsets = [0, 16], sizes = [16, 8], strides = [1, 1]} : vector<16x32xf32> to vector<16x8xf32>
    %56 = vector.extract_strided_slice %32 {offsets = [0, 24], sizes = [16, 8], strides = [1, 1]} : vector<16x32xf32> to vector<16x8xf32>
    %57 = vector.shape_cast %53 : vector<16x8xf32> to vector<1x16x8xf32>
    %58 = vector.shape_cast %54 : vector<16x8xf32> to vector<1x16x8xf32>
    %59 = vector.shape_cast %55 : vector<16x8xf32> to vector<1x16x8xf32>
    %60 = vector.shape_cast %56 : vector<16x8xf32> to vector<1x16x8xf32>
    %61 = tpu.concatenate %57, %58, %59, %60 in 0 : vector<1x16x8xf32>, vector<1x16x8xf32>, vector<1x16x8xf32>, vector<1x16x8xf32> -> vector<4x16x8xf32>
    %62 = vector.shape_cast %61 : vector<4x16x8xf32> to vector<8x8x8xf32>
    %63 = arith.truncf %42 : vector<8x8x8xf32> to vector<8x8x8xbf16>
    %64 = arith.truncf %52 : vector<8x8x8xf32> to vector<8x8x8xbf16>
    %cst_20 = arith.constant dense<0.000000e+00> : vector<8x8x8xf32>
    %65 = tpu.matmul %63, %64, %cst_20 {dimension_numbers = #tpu.dot_dimension_numbers<[2], [2], [1], [1], [0, 0, 0, 1, 1, 1], [0], [0]>} : vector<8x8x8xbf16>, vector<8x8x8xbf16>, vector<8x8x8xf32> -> vector<8x8x8xf32>
    %cst_21 = arith.constant dense<0xFF800000> : vector<8x8xf32>
    %66 = vector.multi_reduction <maximumf>, %65, %cst_21 [2] : vector<8x8x8xf32> to vector<8x8xf32>
    %67 = vector.shape_cast %66 : vector<8x8xf32> to vector<8x8x1xf32>
    %68 = vector.broadcast %67 : vector<8x8x1xf32> to vector<8x8x8xf32>
    %69 = arith.subf %65, %68 : vector<8x8x8xf32>
    %70 = math.exp %69 : vector<8x8x8xf32>
    %cst_22 = arith.constant dense<0.000000e+00> : vector<8x8xf32>
    %71 = vector.multi_reduction <add>, %70, %cst_22 [2] : vector<8x8x8xf32> to vector<8x8xf32>
    %72 = vector.shape_cast %71 : vector<8x8xf32> to vector<8x8x1xf32>
    %73 = tpu.reciprocal %72 {approx = true} : vector<8x8x1xf32> -> vector<8x8x1xf32>
    %74 = vector.broadcast %73 : vector<8x8x1xf32> to vector<8x8x8xf32>
    %75 = arith.mulf %70, %74 : vector<8x8x8xf32>
    %76 = arith.truncf %75 : vector<8x8x8xf32> to vector<8x8x8xbf16>
    %77 = arith.truncf %62 : vector<8x8x8xf32> to vector<8x8x8xbf16>
    %cst_23 = arith.constant dense<0.000000e+00> : vector<8x8x8xf32>
    %78 = tpu.matmul %76, %77, %cst_23 {dimension_numbers = #tpu.dot_dimension_numbers<[2], [1], [1], [2], [0, 0, 0, 1, 1, 2], [0], [0]>} : vector<8x8x8xbf16>, vector<8x8x8xbf16>, vector<8x8x8xf32> -> vector<8x8x8xf32>
    %79 = vector.extract_strided_slice %78 {offsets = [0, 0, 0], sizes = [2, 8, 8], strides = [1, 1, 1]} : vector<8x8x8xf32> to vector<2x8x8xf32>
    %80 = vector.shape_cast %79 : vector<2x8x8xf32> to vector<16x8xf32>
    %81 = vector.extract_strided_slice %78 {offsets = [2, 0, 0], sizes = [2, 8, 8], strides = [1, 1, 1]} : vector<8x8x8xf32> to vector<2x8x8xf32>
    %82 = vector.shape_cast %81 : vector<2x8x8xf32> to vector<16x8xf32>
    %83 = vector.extract_strided_slice %78 {offsets = [4, 0, 0], sizes = [2, 8, 8], strides = [1, 1, 1]} : vector<8x8x8xf32> to vector<2x8x8xf32>
    %84 = vector.shape_cast %83 : vector<2x8x8xf32> to vector<16x8xf32>
    %85 = vector.extract_strided_slice %78 {offsets = [6, 0, 0], sizes = [2, 8, 8], strides = [1, 1, 1]} : vector<8x8x8xf32> to vector<2x8x8xf32>
    %86 = vector.shape_cast %85 : vector<2x8x8xf32> to vector<16x8xf32>
    %87 = tpu.concatenate %80, %82, %84, %86 in 1 : vector<16x8xf32>, vector<16x8xf32>, vector<16x8xf32>, vector<16x8xf32> -> vector<16x32xf32>
    %88 = arith.truncf %87 : vector<16x32xf32> to vector<16x32xbf16>
    %89 = vector.extract_strided_slice %5 {offsets = [0, 96], sizes = [32, 32], strides = [1, 1]} : vector<32x128xbf16> to vector<32x32xbf16>
    %cst_24 = arith.constant dense<0.000000e+00> : vector<16x32xf32>
    %90 = tpu.matmul %88, %89, %cst_24 {dimension_numbers = #tpu.dot_dimension_numbers<[1], [0], [0], [1], [0, 0, 1, 1], [], []>} : vector<16x32xbf16>, vector<32x32xbf16>, vector<16x32xf32> -> vector<16x32xf32>
    %91 = vector.broadcast %16 : vector<1x32xf32> to vector<16x32xf32>
    %92 = arith.addf %90, %91 : vector<16x32xf32>
    %93 = arith.addf %0, %92 : vector<16x32xf32>
    %94 = vector.extract_strided_slice %11 {offsets = [3, 0], sizes = [1, 32], strides = [1, 1]} : vector<9x32xf32> to vector<1x32xf32>
    %95 = vector.extract_strided_slice %11 {offsets = [4, 0], sizes = [1, 32], strides = [1, 1]} : vector<9x32xf32> to vector<1x32xf32>
    %cst_25 = arith.constant dense<0.000000e+00> : vector<16xf32>
    %96 = vector.multi_reduction <add>, %93, %cst_25 [1] : vector<16x32xf32> to vector<16xf32>
    %97 = vector.shape_cast %96 : vector<16xf32> to vector<16x1xf32>
    %cst_26 = arith.constant 3.200000e+01 : f32
    %98 = vector.broadcast %cst_26 : f32 to vector<16x1xf32>
    %99 = arith.divf %97, %98 : vector<16x1xf32>
    %100 = vector.broadcast %99 : vector<16x1xf32> to vector<16x32xf32>
    %101 = arith.subf %93, %100 : vector<16x32xf32>
    %102 = arith.mulf %101, %101 : vector<16x32xf32>
    %cst_27 = arith.constant dense<0.000000e+00> : vector<16xf32>
    %103 = vector.multi_reduction <add>, %102, %cst_27 [1] : vector<16x32xf32> to vector<16xf32>
    %104 = vector.shape_cast %103 : vector<16xf32> to vector<16x1xf32>
    %cst_28 = arith.constant 3.200000e+01 : f32
    %105 = vector.broadcast %cst_28 : f32 to vector<16x1xf32>
    %106 = arith.divf %104, %105 : vector<16x1xf32>
    %107 = vector.broadcast %99 : vector<16x1xf32> to vector<16x32xf32>
    %108 = arith.subf %93, %107 : vector<16x32xf32>
    %cst_29 = arith.constant 9.99999974E-6 : f32
    %109 = vector.broadcast %cst_29 : f32 to vector<16x1xf32>
    %110 = arith.addf %106, %109 : vector<16x1xf32>
    %111 = math.rsqrt %110 : vector<16x1xf32>
    %112 = vector.broadcast %111 : vector<16x1xf32> to vector<16x32xf32>
    %113 = arith.mulf %108, %112 : vector<16x32xf32>
    %114 = vector.broadcast %94 : vector<1x32xf32> to vector<16x32xf32>
    %115 = arith.mulf %113, %114 : vector<16x32xf32>
    %116 = vector.broadcast %95 : vector<1x32xf32> to vector<16x32xf32>
    %117 = arith.addf %115, %116 : vector<16x32xf32>
    %118 = arith.addf %117, %1 : vector<16x32xf32>
    %119 = vector.extract_strided_slice %11 {offsets = [1, 0], sizes = [1, 32], strides = [1, 1]} : vector<9x32xf32> to vector<1x32xf32>
    %120 = arith.truncf %118 : vector<16x32xf32> to vector<16x32xbf16>
    %121 = vector.extract_strided_slice %7 {offsets = [0, 0], sizes = [32, 32], strides = [1, 1]} : vector<32x128xbf16> to vector<32x32xbf16>
    %cst_30 = arith.constant dense<0.000000e+00> : vector<16x32xf32>
    %122 = tpu.matmul %120, %121, %cst_30 {dimension_numbers = #tpu.dot_dimension_numbers<[1], [0], [0], [1], [0, 0, 1, 1], [], []>} : vector<16x32xbf16>, vector<32x32xbf16>, vector<16x32xf32> -> vector<16x32xf32>
    %123 = vector.extract_strided_slice %10 {offsets = [0, 0], sizes = [1, 32], strides = [1, 1]} : vector<1x96xf32> to vector<1x32xf32>
    %124 = vector.broadcast %123 : vector<1x32xf32> to vector<16x32xf32>
    %125 = arith.addf %122, %124 : vector<16x32xf32>
    %cst_31 = arith.constant 0.353553385 : f32
    %126 = vector.broadcast %cst_31 : f32 to vector<16x32xf32>
    %127 = arith.mulf %125, %126 : vector<16x32xf32>
    %128 = arith.truncf %2 : vector<32x32xf32> to vector<32x32xbf16>
    %129 = vector.extract_strided_slice %7 {offsets = [0, 32], sizes = [32, 32], strides = [1, 1]} : vector<32x128xbf16> to vector<32x32xbf16>
    %cst_32 = arith.constant dense<0.000000e+00> : vector<32x32xf32>
    %130 = tpu.matmul %128, %129, %cst_32 {dimension_numbers = #tpu.dot_dimension_numbers<[1], [0], [0], [1], [0, 0, 1, 1], [], []>} : vector<32x32xbf16>, vector<32x32xbf16>, vector<32x32xf32> -> vector<32x32xf32>
    %131 = vector.extract_strided_slice %10 {offsets = [0, 32], sizes = [1, 32], strides = [1, 1]} : vector<1x96xf32> to vector<1x32xf32>
    %132 = vector.broadcast %131 : vector<1x32xf32> to vector<32x32xf32>
    %133 = arith.addf %130, %132 : vector<32x32xf32>
    %134 = arith.truncf %3 : vector<32x32xf32> to vector<32x32xbf16>
    %135 = vector.extract_strided_slice %7 {offsets = [0, 64], sizes = [32, 32], strides = [1, 1]} : vector<32x128xbf16> to vector<32x32xbf16>
    %cst_33 = arith.constant dense<0.000000e+00> : vector<32x32xf32>
    %136 = tpu.matmul %134, %135, %cst_33 {dimension_numbers = #tpu.dot_dimension_numbers<[1], [0], [0], [1], [0, 0, 1, 1], [], []>} : vector<32x32xbf16>, vector<32x32xbf16>, vector<32x32xf32> -> vector<32x32xf32>
    %137 = vector.extract_strided_slice %10 {offsets = [0, 64], sizes = [1, 32], strides = [1, 1]} : vector<1x96xf32> to vector<1x32xf32>
    %138 = vector.broadcast %137 : vector<1x32xf32> to vector<32x32xf32>
    %139 = arith.addf %136, %138 : vector<32x32xf32>
    %140 = vector.extract_strided_slice %127 {offsets = [0, 0], sizes = [16, 8], strides = [1, 1]} : vector<16x32xf32> to vector<16x8xf32>
    %141 = vector.extract_strided_slice %127 {offsets = [0, 8], sizes = [16, 8], strides = [1, 1]} : vector<16x32xf32> to vector<16x8xf32>
    %142 = vector.extract_strided_slice %127 {offsets = [0, 16], sizes = [16, 8], strides = [1, 1]} : vector<16x32xf32> to vector<16x8xf32>
    %143 = vector.extract_strided_slice %127 {offsets = [0, 24], sizes = [16, 8], strides = [1, 1]} : vector<16x32xf32> to vector<16x8xf32>
    %144 = vector.shape_cast %140 : vector<16x8xf32> to vector<1x16x8xf32>
    %145 = vector.shape_cast %141 : vector<16x8xf32> to vector<1x16x8xf32>
    %146 = vector.shape_cast %142 : vector<16x8xf32> to vector<1x16x8xf32>
    %147 = vector.shape_cast %143 : vector<16x8xf32> to vector<1x16x8xf32>
    %148 = tpu.concatenate %144, %145, %146, %147 in 0 : vector<1x16x8xf32>, vector<1x16x8xf32>, vector<1x16x8xf32>, vector<1x16x8xf32> -> vector<4x16x8xf32>
    %149 = vector.shape_cast %148 : vector<4x16x8xf32> to vector<8x8x8xf32>
    %150 = vector.extract_strided_slice %133 {offsets = [0, 0], sizes = [32, 8], strides = [1, 1]} : vector<32x32xf32> to vector<32x8xf32>
    %151 = vector.extract_strided_slice %133 {offsets = [0, 8], sizes = [32, 8], strides = [1, 1]} : vector<32x32xf32> to vector<32x8xf32>
    %152 = vector.extract_strided_slice %133 {offsets = [0, 16], sizes = [32, 8], strides = [1, 1]} : vector<32x32xf32> to vector<32x8xf32>
    %153 = vector.extract_strided_slice %133 {offsets = [0, 24], sizes = [32, 8], strides = [1, 1]} : vector<32x32xf32> to vector<32x8xf32>
    %154 = vector.shape_cast %150 : vector<32x8xf32> to vector<1x32x8xf32>
    %155 = vector.shape_cast %151 : vector<32x8xf32> to vector<1x32x8xf32>
    %156 = vector.shape_cast %152 : vector<32x8xf32> to vector<1x32x8xf32>
    %157 = vector.shape_cast %153 : vector<32x8xf32> to vector<1x32x8xf32>
    %158 = tpu.concatenate %154, %155, %156, %157 in 0 : vector<1x32x8xf32>, vector<1x32x8xf32>, vector<1x32x8xf32>, vector<1x32x8xf32> -> vector<4x32x8xf32>
    %159 = vector.shape_cast %158 : vector<4x32x8xf32> to vector<8x16x8xf32>
    %160 = vector.extract_strided_slice %139 {offsets = [0, 0], sizes = [32, 8], strides = [1, 1]} : vector<32x32xf32> to vector<32x8xf32>
    %161 = vector.extract_strided_slice %139 {offsets = [0, 8], sizes = [32, 8], strides = [1, 1]} : vector<32x32xf32> to vector<32x8xf32>
    %162 = vector.extract_strided_slice %139 {offsets = [0, 16], sizes = [32, 8], strides = [1, 1]} : vector<32x32xf32> to vector<32x8xf32>
    %163 = vector.extract_strided_slice %139 {offsets = [0, 24], sizes = [32, 8], strides = [1, 1]} : vector<32x32xf32> to vector<32x8xf32>
    %164 = vector.shape_cast %160 : vector<32x8xf32> to vector<1x32x8xf32>
    %165 = vector.shape_cast %161 : vector<32x8xf32> to vector<1x32x8xf32>
    %166 = vector.shape_cast %162 : vector<32x8xf32> to vector<1x32x8xf32>
    %167 = vector.shape_cast %163 : vector<32x8xf32> to vector<1x32x8xf32>
    %168 = tpu.concatenate %164, %165, %166, %167 in 0 : vector<1x32x8xf32>, vector<1x32x8xf32>, vector<1x32x8xf32>, vector<1x32x8xf32> -> vector<4x32x8xf32>
    %169 = vector.shape_cast %168 : vector<4x32x8xf32> to vector<8x16x8xf32>
    %170 = arith.truncf %149 : vector<8x8x8xf32> to vector<8x8x8xbf16>
    %171 = arith.truncf %159 : vector<8x16x8xf32> to vector<8x16x8xbf16>
    %cst_34 = arith.constant dense<0.000000e+00> : vector<8x8x16xf32>
    %172 = tpu.matmul %170, %171, %cst_34 {dimension_numbers = #tpu.dot_dimension_numbers<[2], [2], [1], [1], [0, 0, 0, 1, 1, 1], [0], [0]>} : vector<8x8x8xbf16>, vector<8x16x8xbf16>, vector<8x8x16xf32> -> vector<8x8x16xf32>
    %cst_35 = arith.constant dense<0xFF800000> : vector<8x8xf32>
    %173 = vector.multi_reduction <maximumf>, %172, %cst_35 [2] : vector<8x8x16xf32> to vector<8x8xf32>
    %174 = vector.shape_cast %173 : vector<8x8xf32> to vector<8x8x1xf32>
    %175 = vector.broadcast %174 : vector<8x8x1xf32> to vector<8x8x16xf32>
    %176 = arith.subf %172, %175 : vector<8x8x16xf32>
    %177 = math.exp %176 : vector<8x8x16xf32>
    %cst_36 = arith.constant dense<0.000000e+00> : vector<8x8xf32>
    %178 = vector.multi_reduction <add>, %177, %cst_36 [2] : vector<8x8x16xf32> to vector<8x8xf32>
    %179 = vector.shape_cast %178 : vector<8x8xf32> to vector<8x8x1xf32>
    %180 = tpu.reciprocal %179 {approx = true} : vector<8x8x1xf32> -> vector<8x8x1xf32>
    %181 = vector.broadcast %180 : vector<8x8x1xf32> to vector<8x8x16xf32>
    %182 = arith.mulf %177, %181 : vector<8x8x16xf32>
    %183 = arith.truncf %182 : vector<8x8x16xf32> to vector<8x8x16xbf16>
    %184 = arith.truncf %169 : vector<8x16x8xf32> to vector<8x16x8xbf16>
    %cst_37 = arith.constant dense<0.000000e+00> : vector<8x8x8xf32>
    %185 = tpu.matmul %183, %184, %cst_37 {dimension_numbers = #tpu.dot_dimension_numbers<[2], [1], [1], [2], [0, 0, 0, 1, 1, 2], [0], [0]>} : vector<8x8x16xbf16>, vector<8x16x8xbf16>, vector<8x8x8xf32> -> vector<8x8x8xf32>
    %186 = vector.extract_strided_slice %185 {offsets = [0, 0, 0], sizes = [2, 8, 8], strides = [1, 1, 1]} : vector<8x8x8xf32> to vector<2x8x8xf32>
    %187 = vector.shape_cast %186 : vector<2x8x8xf32> to vector<16x8xf32>
    %188 = vector.extract_strided_slice %185 {offsets = [2, 0, 0], sizes = [2, 8, 8], strides = [1, 1, 1]} : vector<8x8x8xf32> to vector<2x8x8xf32>
    %189 = vector.shape_cast %188 : vector<2x8x8xf32> to vector<16x8xf32>
    %190 = vector.extract_strided_slice %185 {offsets = [4, 0, 0], sizes = [2, 8, 8], strides = [1, 1, 1]} : vector<8x8x8xf32> to vector<2x8x8xf32>
    %191 = vector.shape_cast %190 : vector<2x8x8xf32> to vector<16x8xf32>
    %192 = vector.extract_strided_slice %185 {offsets = [6, 0, 0], sizes = [2, 8, 8], strides = [1, 1, 1]} : vector<8x8x8xf32> to vector<2x8x8xf32>
    %193 = vector.shape_cast %192 : vector<2x8x8xf32> to vector<16x8xf32>
    %194 = tpu.concatenate %187, %189, %191, %193 in 1 : vector<16x8xf32>, vector<16x8xf32>, vector<16x8xf32>, vector<16x8xf32> -> vector<16x32xf32>
    %195 = arith.truncf %194 : vector<16x32xf32> to vector<16x32xbf16>
    %196 = vector.extract_strided_slice %7 {offsets = [0, 96], sizes = [32, 32], strides = [1, 1]} : vector<32x128xbf16> to vector<32x32xbf16>
    %cst_38 = arith.constant dense<0.000000e+00> : vector<16x32xf32>
    %197 = tpu.matmul %195, %196, %cst_38 {dimension_numbers = #tpu.dot_dimension_numbers<[1], [0], [0], [1], [0, 0, 1, 1], [], []>} : vector<16x32xbf16>, vector<32x32xbf16>, vector<16x32xf32> -> vector<16x32xf32>
    %198 = vector.broadcast %119 : vector<1x32xf32> to vector<16x32xf32>
    %199 = arith.addf %197, %198 : vector<16x32xf32>
    %200 = arith.addf %117, %199 : vector<16x32xf32>
    %201 = vector.extract_strided_slice %11 {offsets = [5, 0], sizes = [1, 32], strides = [1, 1]} : vector<9x32xf32> to vector<1x32xf32>
    %202 = vector.extract_strided_slice %11 {offsets = [6, 0], sizes = [1, 32], strides = [1, 1]} : vector<9x32xf32> to vector<1x32xf32>
    %cst_39 = arith.constant dense<0.000000e+00> : vector<16xf32>
    %203 = vector.multi_reduction <add>, %200, %cst_39 [1] : vector<16x32xf32> to vector<16xf32>
    %204 = vector.shape_cast %203 : vector<16xf32> to vector<16x1xf32>
    %cst_40 = arith.constant 3.200000e+01 : f32
    %205 = vector.broadcast %cst_40 : f32 to vector<16x1xf32>
    %206 = arith.divf %204, %205 : vector<16x1xf32>
    %207 = vector.broadcast %206 : vector<16x1xf32> to vector<16x32xf32>
    %208 = arith.subf %200, %207 : vector<16x32xf32>
    %209 = arith.mulf %208, %208 : vector<16x32xf32>
    %cst_41 = arith.constant dense<0.000000e+00> : vector<16xf32>
    %210 = vector.multi_reduction <add>, %209, %cst_41 [1] : vector<16x32xf32> to vector<16xf32>
    %211 = vector.shape_cast %210 : vector<16xf32> to vector<16x1xf32>
    %cst_42 = arith.constant 3.200000e+01 : f32
    %212 = vector.broadcast %cst_42 : f32 to vector<16x1xf32>
    %213 = arith.divf %211, %212 : vector<16x1xf32>
    %214 = vector.broadcast %206 : vector<16x1xf32> to vector<16x32xf32>
    %215 = arith.subf %200, %214 : vector<16x32xf32>
    %cst_43 = arith.constant 9.99999974E-6 : f32
    %216 = vector.broadcast %cst_43 : f32 to vector<16x1xf32>
    %217 = arith.addf %213, %216 : vector<16x1xf32>
    %218 = math.rsqrt %217 : vector<16x1xf32>
    %219 = vector.broadcast %218 : vector<16x1xf32> to vector<16x32xf32>
    %220 = arith.mulf %215, %219 : vector<16x32xf32>
    %221 = vector.broadcast %201 : vector<1x32xf32> to vector<16x32xf32>
    %222 = arith.mulf %220, %221 : vector<16x32xf32>
    %223 = vector.broadcast %202 : vector<1x32xf32> to vector<16x32xf32>
    %224 = arith.addf %222, %223 : vector<16x32xf32>
    %225 = arith.truncf %224 : vector<16x32xf32> to vector<16x32xbf16>
    %cst_44 = arith.constant dense<0.000000e+00> : vector<16x128xf32>
    %226 = tpu.matmul %225, %13, %cst_44 {dimension_numbers = #tpu.dot_dimension_numbers<[1], [0], [0], [1], [0, 0, 1, 1], [], []>} : vector<16x32xbf16>, vector<32x128xbf16>, vector<16x128xf32> -> vector<16x128xf32>
    %227 = vector.broadcast %12 : vector<1x128xf32> to vector<16x128xf32>
    %228 = arith.addf %226, %227 : vector<16x128xf32>
    %cst_45 = arith.constant 0.000000e+00 : f32
    %229 = vector.broadcast %cst_45 : f32 to vector<16x128xf32>
    %230 = arith.maximumf %228, %229 : vector<16x128xf32>
    %231 = arith.truncf %230 : vector<16x128xf32> to vector<16x128xbf16>
    %cst_46 = arith.constant dense<0.000000e+00> : vector<16x32xf32>
    %232 = tpu.matmul %231, %14, %cst_46 {dimension_numbers = #tpu.dot_dimension_numbers<[1], [0], [0], [1], [0, 0, 1, 1], [], []>} : vector<16x128xbf16>, vector<128x32xbf16>, vector<16x32xf32> -> vector<16x32xf32>
    %233 = vector.extract_strided_slice %11 {offsets = [2, 0], sizes = [1, 32], strides = [1, 1]} : vector<9x32xf32> to vector<1x32xf32>
    %234 = vector.broadcast %233 : vector<1x32xf32> to vector<16x32xf32>
    %235 = arith.addf %232, %234 : vector<16x32xf32>
    %236 = arith.addf %224, %235 : vector<16x32xf32>
    %237 = vector.extract_strided_slice %11 {offsets = [7, 0], sizes = [1, 32], strides = [1, 1]} : vector<9x32xf32> to vector<1x32xf32>
    %238 = vector.extract_strided_slice %11 {offsets = [8, 0], sizes = [1, 32], strides = [1, 1]} : vector<9x32xf32> to vector<1x32xf32>
    %cst_47 = arith.constant dense<0.000000e+00> : vector<16xf32>
    %239 = vector.multi_reduction <add>, %236, %cst_47 [1] : vector<16x32xf32> to vector<16xf32>
    %240 = vector.shape_cast %239 : vector<16xf32> to vector<16x1xf32>
    %cst_48 = arith.constant 3.200000e+01 : f32
    %241 = vector.broadcast %cst_48 : f32 to vector<16x1xf32>
    %242 = arith.divf %240, %241 : vector<16x1xf32>
    %243 = vector.broadcast %242 : vector<16x1xf32> to vector<16x32xf32>
    %244 = arith.subf %236, %243 : vector<16x32xf32>
    %245 = arith.mulf %244, %244 : vector<16x32xf32>
    %cst_49 = arith.constant dense<0.000000e+00> : vector<16xf32>
    %246 = vector.multi_reduction <add>, %245, %cst_49 [1] : vector<16x32xf32> to vector<16xf32>
    %247 = vector.shape_cast %246 : vector<16xf32> to vector<16x1xf32>
    %cst_50 = arith.constant 3.200000e+01 : f32
    %248 = vector.broadcast %cst_50 : f32 to vector<16x1xf32>
    %249 = arith.divf %247, %248 : vector<16x1xf32>
    %250 = vector.broadcast %242 : vector<16x1xf32> to vector<16x32xf32>
    %251 = arith.subf %236, %250 : vector<16x32xf32>
    %cst_51 = arith.constant 9.99999974E-6 : f32
    %252 = vector.broadcast %cst_51 : f32 to vector<16x1xf32>
    %253 = arith.addf %249, %252 : vector<16x1xf32>
    %254 = math.rsqrt %253 : vector<16x1xf32>
    %255 = vector.broadcast %254 : vector<16x1xf32> to vector<16x32xf32>
    %256 = arith.mulf %251, %255 : vector<16x32xf32>
    %257 = vector.broadcast %237 : vector<1x32xf32> to vector<16x32xf32>
    %258 = arith.mulf %256, %257 : vector<16x32xf32>
    %259 = vector.broadcast %238 : vector<1x32xf32> to vector<16x32xf32>
    %260 = arith.addf %258, %259 : vector<16x32xf32>
    %c0_52 = arith.constant 0 : index
    %c0_53 = arith.constant 0 : index
    %261 = vector.load %arg9[%c0_52, %c0_53] : memref<16x32xf32, #tpu.memory_space<vmem>>, vector<16x32xf32>
    tpu.vector_store %arg9[%c0_52, %c0_53], %260 {strides = array<i32>} : memref<16x32xf32, #tpu.memory_space<vmem>>, vector<16x32xf32>,
    return
  }
  func.func @transform_0(%arg0: i32) -> (i32, i32) {
    %c0_i32 = arith.constant 0 : i32
    %c0_i32_0 = arith.constant 0 : i32
    return %arg0, %c0_i32 : i32, i32
  }
  func.func @transform_1(%arg0: i32) -> (i32, i32) {
    %c0_i32 = arith.constant 0 : i32
    %c0_i32_0 = arith.constant 0 : i32
    return %arg0, %c0_i32 : i32, i32
  }
  func.func @transform_2(%arg0: i32) -> (i32, i32) {
    %c0_i32 = arith.constant 0 : i32
    %c0_i32_0 = arith.constant 0 : i32
    return %arg0, %c0_i32 : i32, i32
  }
  func.func @transform_3(%arg0: i32) -> (i32, i32) {
    %c0_i32 = arith.constant 0 : i32
    %c0_i32_0 = arith.constant 0 : i32
    return %arg0, %c0_i32 : i32, i32
  }
  func.func @transform_4(%arg0: i32) -> (i32, i32, i32) {
    %c0_i32 = arith.constant 0 : i32
    %c0_i32_0 = arith.constant 0 : i32
    %c0_i32_1 = arith.constant 0 : i32
    %c0_i32_2 = arith.constant 0 : i32
    return %c0_i32, %c0_i32_0, %c0_i32_1 : i32, i32, i32
  }
  func.func @transform_5(%arg0: i32) -> (i32, i32) {
    %c0_i32 = arith.constant 0 : i32
    %c0_i32_0 = arith.constant 0 : i32
    %c0_i32_1 = arith.constant 0 : i32
    return %c0_i32, %c0_i32_0 : i32, i32
  }
  func.func @transform_6(%arg0: i32) -> (i32, i32) {
    %c0_i32 = arith.constant 0 : i32
    %c0_i32_0 = arith.constant 0 : i32
    %c0_i32_1 = arith.constant 0 : i32
    return %c0_i32, %c0_i32_0 : i32, i32
  }
  func.func @transform_7(%arg0: i32) -> (i32, i32) {
    %c0_i32 = arith.constant 0 : i32
    %c0_i32_0 = arith.constant 0 : i32
    %c0_i32_1 = arith.constant 0 : i32
    return %c0_i32, %c0_i32_0 : i32, i32
  }
  func.func @transform_8(%arg0: i32) -> (i32, i32) {
    %c0_i32 = arith.constant 0 : i32
    %c0_i32_0 = arith.constant 0 : i32
    return %arg0, %c0_i32 : i32, i32
  }
}

</mosaic_0001>

<bundles_post_ra>
// kernel: tpu_custom_call.1
= control target key start
LH: loop header
LB: loop body
LE: loop exit
PB: predicated region body
PF: predicated region fallthrough
CT: control target
= control target key end

     0   :  { %13 = vsyncpa [#allocation3], 0  ;;  %s4307_s0 = inlined_call_operand.vmem [shape: f32[16,32], index: 0, kind: input, shape index: {}]   ;;  %s4308_s1 = inlined_call_operand.hbm [shape: f32[16,32], index: 1, kind: input, shape index: {}]   ;;  %s4309_s2 = inlined_call_operand.vmem [shape: f32[32,32], index: 2, kind: input, shape index: {}]   ;;  %s4310_s3 = inlined_call_operand.vmem [shape: f32[32,32], index: 3, kind: input, shape index: {}]   ;;  %s4311_s4 = inlined_call_operand.hbm [shape: bf16[2,32,128], index: 4, kind: input, shape index: {}]   ;;  %s4312_s5 = inlined_call_operand.hbm [shape: f32[12,128], index: 5, kind: input, shape index: {}]   ;;  %s4313_s6 = inlined_call_operand.hbm [shape: bf16[32,128], index: 6, kind: input, shape index: {}]   ;;  %s4314_s7 = inlined_call_operand.vmem [shape: bf16[128,32], index: 7, kind: input, shape index: {}]   ;;  %s4315_s8 = inlined_call_operand.hbm [shape: f32[16,32], index: 8, kind: output, shape index: {}]  }
   0x1   :  { %14 = vsyncpa [#allocation6], 0 }
   0x2   :  { %15 = vsyncpa [#allocation9], 0 }
   0x3   :  { %16 = vsyncpa [#allocation4], 0  ;;  %s3603_s27 = smov [#allocation5]   ;;  %s3485_s9 = scalar_lea.hbm %s4311_s4, 512 }
   0x4   :  { %s40_s28 = sshll.u32 %s3603_s27, 4  ;;  %p3486_p0 = scmp.ne.s32.totalorder %s4311_s4, %s3485_s9  ;;  %s41_s28 = int_to_ptr.vmem [resolvable:$true] %s40_s28 }
   0x5   :  { %p3489_p1 = scmp.lt.u32.totalorder %s3485_s9, %s4311_s4 }
   0x7   :  { %p3491_p2 = pnand %p3489_p1, %p3486_p0 }
   0x9   :  { %3494 = shalt.err (!%p3491_p2)
}
   0xa   :  { %s3495_s14 = scalar_lea.vmem %s41_s28, 512  ;;  %p3500_p4 = scmp.lt.s32.totalorder %s41_s28, %s41_s28 }
   0xb   :  { %p3496_p3 = scmp.ne.s32.totalorder %s41_s28, %s3495_s14  ;;  %p3501_p5 = scmp.lt.s32.totalorder %s3495_s14, %s3495_s14 }
   0xd   :  { %p3502_p6 = por %p3501_p5, %p3500_p4 }
   0xf   :  { %p3503_p7 = pnand %p3502_p6, %p3496_p3 }
  0x11   :  { %3506 = shalt.err (!%p3503_p7)
}
  0x12   :  { %s3604_s15 = smov 64   ;;  %s3605_s16 = smov 4  }
  0x13   :  { %46 = dma.hbm_to_vmem [thread:$0]  %s4311_s4, 512, %s41_s28, [#allocation6], %s3604_s15, %s3604_s15, %s3605_s16  }
  0x14   :  { %s3606_s19 = smov [#allocation2]   ;;  %s3507_s23 = scalar_lea.hbm %s4308_s1, 256 }
  0x15   :  { %s24_s20 = sshll.u32 %s3606_s19, 4  ;;  %p3508_p8 = scmp.ne.s32.totalorder %s4308_s1, %s3507_s23  ;;  %s25_s20 = int_to_ptr.vmem [resolvable:$true] %s24_s20 }
  0x16   :  { %p3511_p9 = scmp.lt.u32.totalorder %s3507_s23, %s4308_s1 }
  0x18   :  { %p3513_p10 = pnand %p3511_p9, %p3508_p8 }
  0x1a   :  { %3516 = shalt.err (!%p3513_p10)
}
  0x1b   :  { %s3517_s29 = scalar_lea.vmem %s25_s20, 256  ;;  %p3522_p12 = scmp.lt.s32.totalorder %s25_s20, %s25_s20 }
  0x1c   :  { %p3518_p11 = scmp.ne.s32.totalorder %s25_s20, %s3517_s29  ;;  %p3523_p13 = scmp.lt.s32.totalorder %s3517_s29, %s3517_s29 }
  0x1e   :  { %p3524_p0 = por %p3523_p13, %p3522_p12 }
  0x20   :  { %p3525_p1 = pnand %p3524_p0, %p3518_p11 }
  0x22   :  { %3528 = shalt.err (!%p3525_p1)
}
  0x23   :  { %s3607_s4 = smov 128   ;;  %s3608_s28 = smov 8  }
  0x24   :  { %30 = dma.hbm_to_vmem [thread:$0]  %s4308_s1, 256, %s25_s20, [#allocation3], %s3607_s4, %s3607_s4, %s3608_s28  }
  0x25   :  { %s3609_s10 = smov [#allocation7]   ;;  %s3610_s12 = smov [#allocation8]  }
  0x26   :  { %s52_s11 = sshll.u32 %s3609_s10, 4  ;;  %s64_s13 = sshll.u32 %s3610_s12, 4  ;;  %s53_s11 = int_to_ptr.vmem [resolvable:$true] %s52_s11  ;;  %s3696_s13 = int_to_ptr.vmem [resolvable:$true] %s64_s13 }
  0x27   :  { %s3529_s18 = scalar_lea.hbm %s4312_s5, 256 }
  0x28   :  { %p3530_p2 = scmp.ne.s32.totalorder %s4312_s5, %s3529_s18  ;;  %p3533_p3 = scmp.lt.u32.totalorder %s3529_s18, %s4312_s5 }
  0x2a   :  { %p3535_p4 = pnand %p3533_p3, %p3530_p2 }
  0x2c   :  { %3538 = shalt.err (!%p3535_p4)
}
  0x2d   :  { %s3539_s1 = scalar_lea.vmem %s53_s11, 256  ;;  %p3544_p6 = scmp.lt.s32.totalorder %s53_s11, %s53_s11 }
  0x2e   :  { %p3540_p5 = scmp.ne.s32.totalorder %s53_s11, %s3539_s1  ;;  %p3545_p7 = scmp.lt.s32.totalorder %s3539_s1, %s3539_s1 }
  0x30   :  { %p3546_p8 = por %p3545_p7, %p3544_p6 }
  0x32   :  { %p3547_p9 = pnand %p3546_p8, %p3540_p5 }
  0x34   :  { %3550 = shalt.err (!%p3547_p9)
}
  0x35   :  { %58 = dma.hbm_to_vmem [thread:$0]  %s4312_s5, 256, %s53_s11, [#allocation6], %s3607_s4, %s3607_s4, %s3608_s28  }
  0x36   :  { %s3551_s27 = scalar_lea.hbm %s4313_s6, 256 }
  0x37   :  { %p3552_p10 = scmp.ne.s32.totalorder %s4313_s6, %s3551_s27  ;;  %p3555_p11 = scmp.lt.u32.totalorder %s3551_s27, %s4313_s6 }
  0x39   :  { %p3557_p12 = pnand %p3555_p11, %p3552_p10 }
  0x3b   :  { %3560 = shalt.err (!%p3557_p12)
}
  0x3c   :  { %s3561_s12 = scalar_lea.vmem %s3696_s13, 256  ;;  %p3566_p0 = scmp.lt.s32.totalorder %s3696_s13, %s3696_s13 }
  0x3d   :  { %p3562_p13 = scmp.ne.s32.totalorder %s3696_s13, %s3561_s12  ;;  %p3567_p1 = scmp.lt.s32.totalorder %s3561_s12, %s3561_s12 }
  0x3f   :  { %p3568_p2 = por %p3567_p1, %p3566_p0 }
  0x41   :  { %p3569_p3 = pnand %p3568_p2, %p3562_p13 }
  0x43   :  { %3572 = shalt.err (!%p3569_p3)
}
  0x44   :  { %70 = dma.hbm_to_vmem [thread:$0]  %s4313_s6, 256, %s3696_s13, [#allocation9], %s3604_s15, %s3604_s15, %s3605_s16  }
  0x45   :  { %3595 = dma.done.wait [#allocation3], 256  }
  0x46   :  { %3596 = vsyncadd [#allocation3], 4294967040 }
  0x47   :  { %3597 = dma.done.wait [#allocation6], 768  }
  0x48   :  { %3598 = vsyncadd [#allocation6], 4294966528 }
  0x49   :  { %3599 = dma.done.wait [#allocation9], 256  }
  0x4a   :  { %3600 = vsyncadd [#allocation9], 4294967040  ;;  %v3611_v0 = vmov 0.0   ;;  %vm3612_vm0 = vmmov 0   ;;  %v3739_v1 = vld [vmem:[#allocation5] sm:$0xff]   ;;  %v3741_v2 = vld [vmem:[#allocation5 + $0x8] sm:$0xff]   ;;  %v132_v10 = vlaneseq }
  0x4b   :  { %2948 = vmatprep.subr.bf16.mxu1 %v3611_v0  ;;  %2952 = vmatprep.mubr.msk.bf16.mxu1 %vm3612_vm0, %v3611_v0  ;;  %v3747_v3 = vld [vmem:[%s4307_s0] sm:$0xff]  ;;  %v3752_v4 = vld [vmem:[%s4307_s0 + $0x8] sm:$0xff]  ;;  %vm148_vm1 = vcmask 261120   ;;  %v3765_v13 = vld [vmem:[#allocation7] sm:$0xff]  ;;  %s3613_s0 = smov 104   ;;  %s3614_s17 = smov 120  }
  0x4c   :  { %2976 = vmatprep.subr.bf16.mxu0 %v3611_v0  ;;  %2978 = vmatprep.mubr.msk.bf16.mxu0 %vm3612_vm0, %v3611_v0  ;;  %v88_v5 = vld [vmem:[#allocation2] sm:$0xff]  ;;  %v89_v6 = vld [vmem:[#allocation2 + $0x8] sm:$0xff]  ;;  %v3762_v11 = vshrl.u32 %v132_v10, 7  ;;  %s3615_s18 = smov 112   ;;  %s3616_s19 = smov 96   ;;  %v195_v39 = vpack.c.bf16 %v3752_v4, %v3747_v3  ;;  %vm329_vm2 = vcmask 64512  }
  0x4d   :  { %2949 = vmatpush3.bf16.msra.mxu1 %v3739_v1  ;;  %v129_v7 = vadd.f32 %v88_v5, %v3747_v3  ;;  %v130_v8 = vadd.f32 %v89_v6, %v3752_v4  ;;  %vm826_vm3 = vcmask 1043456   ;;  %s3617_s21 = smov 32   ;;  %s3618_s22 = smov 16   ;;  %vm1218_vm4 = vcmask 130048  }
  0x4e   :  { %2950 = vmatprep.subr.bf16.mxu1 %v3611_v0  ;;  %v134_v12 = vsub.s32 0, %v3762_v11  ;;  %s3619_s23 = smov 24   ;;  %vm1221_vm5 = vcmask 195584  }
  0x4f   :  { %v131_v9 = vpack.c.bf16 %v130_v8, %v129_v7 }
  0x50   :  { %v3770_v14 = vrot.slane %v3765_v13, %v134_v12 }
  0x51   :  { %2951 = vmatpush3.bf16.msra.mxu1 %v3741_v2 }
  0x52   :  { %2956 = vmatprep.subr.bf16.mxu1 %v3611_v0 }
  0x54   :  { %2953 = vmatmul.mubr.msk.bf16.vlgmr.msra.gmra.mrb[0].mxu1 %vm148_vm1, %v131_v9 }
  0x55   :  { %2960 = vmatprep.mubr.msk.bf16.mxu1 %vm3612_vm0, %v3611_v0 }
 0x127   :  { %v186_v15 = vpop.f32.mrb[0].mxu1 }
 0x128   :  { %v2954_v16 = vpop.f32.mrb[1].mxu1  ;;  %v187_v17 = vadd.f32 %v186_v15, %v3770_v14 }
 0x129   :  { %v189_v18 = vpop.f32.mrb[2].mxu1 }
 0x12a   :  { %v190_v19 = vadd.f32 %v189_v18, %v3770_v14  ;;  %v2955_v20 = vpop.f32.mrb[3].mxu1  ;;  %v193_v22 = vmul.f32 0.35355338, %v187_v17  ;;  %v318_v25 = vpack.c.bf16 %v187_v17, %v187_v17 }
 0x12c   :  { %v3252_v21 = vpack.i.bf16 %v190_v19, %v187_v17  ;;  %v194_v23 = vmul.f32 0.35355338, %v190_v19  ;;  %v319_v26 = vpack.c.bf16 %v190_v19, %v190_v19  ;;  %v310_v48 = vpack.c.bf16 %v193_v22, %v193_v22 }
 0x12e   :  { %3253 = vrot.lane.b32.xlu1 %v3252_v21, %s3613_s0  ;;  %3243 = vrot.lane.b32.xlu0 %v3252_v21, %s3614_s17  ;;  %v3257_v24 = vpack.i.bf16 %v194_v23, %v193_v22  ;;  %v311_v50 = vpack.c.bf16 %v194_v23, %v194_v23 }
 0x132   :  { %196 = vrot.lane.b32.xlu1 %v3739_v1, %s3604_s15  ;;  %3248 = vrot.lane.b32.xlu0 %v3252_v21, %s3615_s18 }
 0x136   :  { %327 = vrot.lane.b32.xlu1 %v318_v25, %s3616_s19  ;;  %198 = vrot.lane.b32.xlu0 %v3741_v2, %s3604_s15 }
 0x13a   :  { %377 = vrot.lane.b32.xlu0 %v319_v26, %s3616_s19 }
 0x1a0   :  { %v3254_v27 = vpop.permute.xlu1 %3253  ;;  %v3244_v28 = vpop.permute.xlu0 %3243 }
 0x1a1   :  { %v3246_v29 = vunpack.i.h.bf16 %v3244_v28  ;;  %v3245_v30 = vunpack.i.l.bf16 %v3244_v28  ;;  %v3255_v40 = vunpack.i.l.bf16 %v3254_v27  ;;  %v3256_v42 = vunpack.i.h.bf16 %v3254_v27 }
 0x1a3   :  { %v320_v31 = vpack.c.bf16 %v3245_v30, %v3245_v30  ;;  %v321_v32 = vpack.c.bf16 %v3246_v29, %v3246_v29  ;;  %v324_v44 = vpack.c.bf16 %v3255_v40, %v3255_v40  ;;  %v325_v45 = vpack.c.bf16 %v3256_v42, %v3256_v42 }
 0x1a4   :  { %v197_v33 = vpop.permute.xlu1 %196  ;;  %v3249_v34 = vpop.permute.xlu0 %3248 }
 0x1a5   :  { %v3250_v35 = vunpack.i.l.bf16 %v3249_v34  ;;  %2957 = vmatpush3.bf16.msra.mxu1 %v197_v33  ;;  %426 = vrot.lane.b32.xlu1 %v320_v31, %s3616_s19  ;;  %v3251_v36 = vunpack.i.h.bf16 %v3249_v34 }
 0x1a6   :  { %475 = vrot.lane.b32.xlu0 %v321_v32, %s3616_s19  ;;  %2958 = vmatprep.subr.bf16.mxu1 %v3611_v0 }
 0x1a7   :  { %v322_v37 = vpack.c.bf16 %v3250_v35, %v3250_v35  ;;  %v323_v41 = vpack.c.bf16 %v3251_v36, %v3251_v36 }
 0x1a8   :  { %v199_v38 = vpop.permute.xlu0 %198  ;;  %v328_v43 = vpop.permute.xlu1 %327 }
 0x1a9   :  { %2959 = vmatpush3.bf16.msra.mxu1 %v199_v38  ;;  %3258 = vrot.lane.b32.xlu1 %v3257_v24, %s3614_s17  ;;  %v334_v46 = vsel %vm329_vm2, %v328_v43, 0 }
 0x1aa   :  { %524 = vrot.lane.b32.xlu0 %v322_v37, %s3616_s19  ;;  %2964 = vmatprep.subr.bf16.mxu1 %v3611_v0 }
 0x1ac   :  { %2961 = vmatmul.mubr.msk.bf16.vlgmr.msra.gmra.mrb[4].mxu1 %vm148_vm1, %v195_v39  ;;  %v378_v47 = vpop.permute.xlu0 %377 }
 0x1ad   :  { %573 = vrot.lane.b32.xlu1 %v323_v41, %s3616_s19  ;;  %2966 = vmatprep.mubr.msk.bf16.mxu1 %vm3612_vm0, %v3611_v0  ;;  %v383_v49 = vsel %vm329_vm2, %v378_v47, 0 }
 0x1ae   :  { %3263 = vrot.lane.b32.xlu0 %v3257_v24, %s3615_s18 }
 0x1b1   :  { %622 = vrot.lane.b32.xlu1 %v324_v44, %s3616_s19 }
 0x1b2   :  { %671 = vrot.lane.b32.xlu0 %v325_v45, %s3616_s19  ;;  %2965 = vmatpush3.bf16.xpose.msra.mxu1 %v334_v46 }
 0x1b3   :  { %2970 = vmatprep.subr.bf16.mxu1 %v3611_v0 }
 0x1b5   :  { %3268 = vrot.lane.b32.xlu1 %v3257_v24, %s3613_s0 }
 0x1b9   :  { %2967 = vmatmul.mubr.msk.bf16.vlgmr.msra.gmra.mrb[8].mxu1 %vm329_vm2, %v310_v48 }
 0x1ba   :  { %2971 = vmatpush3.bf16.xpose.msra.mxu1 %v383_v49  ;;  %2972 = vmatprep.mubr.msk.bf16.mxu1 %vm3612_vm0, %v3611_v0 }
 0x1bb   :  { %2982 = vmatprep.subr.bf16.mxu1 %v3611_v0 }
 0x1c1   :  { %2973 = vmatmul.mubr.msk.bf16.vlgmr.msra.gmra.mrb[12].mxu1 %vm329_vm2, %v311_v50 }
 0x1c2   :  { %2984 = vmatprep.mubr.msk.bf16.mxu1 %vm3612_vm0, %v3611_v0 }
 0x217   :  { %v427_v51 = vpop.permute.xlu1 %426 }
 0x218   :  { %v476_v52 = vpop.permute.xlu0 %475  ;;  %v432_v53 = vsel %vm329_vm2, %v427_v51, 0 }
 0x219   :  { %v481_v54 = vsel %vm329_vm2, %v476_v52, 0  ;;  %2977 = vmatpush3.bf16.xpose.msra.mxu0 %v432_v53 }
 0x21a   :  { %2983 = vmatpush3.bf16.xpose.msra.mxu1 %v481_v54  ;;  %2988 = vmatprep.subr.bf16.mxu0 %v3611_v0 }
 0x21b   :  { %v3259_v55 = vpop.permute.xlu1 %3258  ;;  %2994 = vmatprep.subr.bf16.mxu1 %v3611_v0 }
 0x21c   :  { %v525_v56 = vpop.permute.xlu0 %524  ;;  %v3261_v57 = vunpack.i.h.bf16 %v3259_v55  ;;  %v3260_v58 = vunpack.i.l.bf16 %v3259_v55 }
 0x21d   :  { %v530_v62 = vsel %vm329_vm2, %v525_v56, 0 }
 0x21e   :  { %v313_v59 = vpack.c.bf16 %v3261_v57, %v3261_v57  ;;  %v312_v60 = vpack.c.bf16 %v3260_v58, %v3260_v58 }
 0x21f   :  { %v574_v61 = vpop.permute.xlu1 %573 }
 0x220   :  { %v3264_v63 = vpop.permute.xlu0 %3263  ;;  %v579_v5 = vsel %vm329_vm2, %v574_v61, 0  ;;  %2979 = vmatmul.mubr.msk.bf16.vlgmr.msra.gmra.mrb[0].mxu0 %vm329_vm2, %v312_v60 }
 0x221   :  { %2985 = vmatmul.mubr.msk.bf16.vlgmr.msra.gmra.mrb[16].mxu1 %vm329_vm2, %v313_v59  ;;  %2989 = vmatpush3.bf16.xpose.msra.mxu0 %v530_v62  ;;  %v3265_v6 = vunpack.i.l.bf16 %v3264_v63  ;;  %v3266_v7 = vunpack.i.h.bf16 %v3264_v63 }
 0x222   :  { %2995 = vmatpush3.bf16.xpose.msra.mxu1 %v579_v5  ;;  %2990 = vmatprep.mubr.msk.bf16.mxu0 %vm3612_vm0, %v3611_v0 }
 0x223   :  { %v623_v8 = vpop.permute.xlu1 %622  ;;  %2996 = vmatprep.mubr.msk.bf16.mxu1 %vm3612_vm0, %v3611_v0  ;;  %3000 = vmatprep.subr.bf16.mxu0 %v3611_v0  ;;  %v314_v9 = vpack.c.bf16 %v3265_v6, %v3265_v6  ;;  %v315_v15 = vpack.c.bf16 %v3266_v7, %v3266_v7 }
 0x224   :  { %3006 = vmatprep.subr.bf16.mxu1 %v3611_v0  ;;  %v672_v10 = vpop.permute.xlu0 %671  ;;  %v628_v17 = vsel %vm329_vm2, %v623_v8, 0 }
 0x225   :  { %v677_v18 = vsel %vm329_vm2, %v672_v10, 0 }
 0x227   :  { %v3269_v16 = vpop.permute.xlu1 %3268 }
 0x228   :  { %2991 = vmatmul.mubr.msk.bf16.vlgmr.msra.gmra.mrb[4].mxu0 %vm329_vm2, %v314_v9  ;;  %v3270_v19 = vunpack.i.l.bf16 %v3269_v16  ;;  %v3271_v20 = vunpack.i.h.bf16 %v3269_v16 }
 0x229   :  { %2997 = vmatmul.mubr.msk.bf16.vlgmr.msra.gmra.mrb[20].mxu1 %vm329_vm2, %v315_v15  ;;  %3001 = vmatpush3.bf16.xpose.msra.mxu0 %v628_v17 }
 0x22a   :  { %3007 = vmatpush3.bf16.xpose.msra.mxu1 %v677_v18  ;;  %3002 = vmatprep.mubr.msk.bf16.mxu0 %vm3612_vm0, %v3611_v0  ;;  %v316_v21 = vpack.c.bf16 %v3270_v19, %v3270_v19  ;;  %v317_v22 = vpack.c.bf16 %v3271_v20, %v3271_v20 }
 0x22b   :  { %3008 = vmatprep.mubr.msk.bf16.mxu1 %vm3612_vm0, %v3611_v0  ;;  %3012 = vmatprep.subr.bf16.mxu0 %v3611_v0 }
 0x22c   :  { %3018 = vmatprep.subr.bf16.mxu1 %v3611_v0 }
 0x230   :  { %3003 = vmatmul.mubr.msk.bf16.vlgmr.msra.gmra.mrb[8].mxu0 %vm329_vm2, %v316_v21 }
 0x231   :  { %3009 = vmatmul.mubr.msk.bf16.vlgmr.msra.gmra.mrb[24].mxu1 %vm329_vm2, %v317_v22  ;;  %3014 = vmatprep.mubr.msk.bf16.mxu0 %vm3612_vm0, %v3611_v0 }
 0x232   :  { %3020 = vmatprep.mubr.msk.bf16.mxu1 %vm3612_vm0, %v3611_v0 }
 0x27f   :  { %v243_v23 = vpop.f32.mrb[4].mxu1 }
 0x280   :  { %v2962_v24 = vpop.f32.mrb[5].mxu1 }
 0x281   :  { %v246_v25 = vpop.f32.mrb[6].mxu1 }
 0x282   :  { %v2963_v26 = vpop.f32.mrb[7].mxu1 }
 0x28c   :  { %v3839_v27 = vpop.f32.mrb[8].mxu1 }
 0x28d   :  { %v2968_v28 = vpop.f32.mrb[9].mxu1  ;;  %v719_v29 = vsel %vm329_vm2, %v3839_v27, -inf }
 0x28e   :  { %720 = vmax.xlane.f32.xlu0 %v719_v29  ;;  %v373_v30 = vpop.f32.mrb[10].mxu1 }
 0x28f   :  { %v2969_v31 = vpop.f32.mrb[11].mxu1 }
 0x294   :  { %v3843_v32 = vpop.f32.mrb[12].mxu1 }
 0x295   :  { %v2974_v33 = vpop.f32.mrb[13].mxu1  ;;  %v722_v34 = vsel %vm329_vm2, %v3843_v32, -inf }
 0x296   :  { %723 = vmax.xlane.f32.xlu1 %v722_v34  ;;  %v422_v35 = vpop.f32.mrb[14].mxu1 }
 0x297   :  { %v2975_v36 = vpop.f32.mrb[15].mxu1 }
 0x2f3   :  { %v3847_v37 = vpop.f32.mrb[0].mxu0 }
 0x2f4   :  { %v3849_v38 = vpop.f32.mrb[16].mxu1  ;;  %v2980_v39 = vpop.f32.mrb[1].mxu0  ;;  %v725_v40 = vsel %vm329_vm2, %v3847_v37, -inf }
 0x2f5   :  { %v2986_v41 = vpop.f32.mrb[17].mxu1  ;;  %v471_v42 = vpop.f32.mrb[2].mxu0  ;;  %726 = vmax.xlane.f32.xlu0 %v725_v40  ;;  %v728_v46 = vsel %vm329_vm2, %v3849_v38, -inf }
 0x2f6   :  { %v520_v43 = vpop.f32.mrb[18].mxu1  ;;  %v2981_v44 = vpop.f32.mrb[3].mxu0 }
 0x2f7   :  { %v2987_v45 = vpop.f32.mrb[19].mxu1 }
 0x2f9   :  { %729 = vmax.xlane.f32.xlu0 %v728_v46 }
 0x2fb   :  { %v566_v47 = vpop.f32.mrb[4].mxu0 }
 0x2fc   :  { %v3855_v48 = vpop.f32.mrb[20].mxu1  ;;  %v2992_v49 = vpop.f32.mrb[5].mxu0  ;;  %v731_v50 = vsel %vm329_vm2, %v566_v47, -inf }
 0x2fd   :  { %v2998_v51 = vpop.f32.mrb[21].mxu1  ;;  %v569_v52 = vpop.f32.mrb[6].mxu0  ;;  %732 = vmax.xlane.f32.xlu1 %v731_v50  ;;  %v734_v53 = vsel %vm329_vm2, %v3855_v48, -inf }
 0x2fe   :  { %735 = vmax.xlane.f32.xlu0 %v734_v53  ;;  %v618_v54 = vpop.f32.mrb[22].mxu1  ;;  %v2993_v55 = vpop.f32.mrb[7].mxu0 }
 0x2ff   :  { %v2999_v56 = vpop.f32.mrb[23].mxu1 }
 0x303   :  { %v664_v57 = vpop.f32.mrb[8].mxu0 }
 0x304   :  { %v3860_v58 = vpop.f32.mrb[24].mxu1  ;;  %v3004_v59 = vpop.f32.mrb[9].mxu0  ;;  %v737_v60 = vsel %vm329_vm2, %v664_v57, -inf }
 0x305   :  { %v3010_v61 = vpop.f32.mrb[25].mxu1  ;;  %v667_v62 = vpop.f32.mrb[10].mxu0  ;;  %738 = vmax.xlane.f32.xlu1 %v737_v60  ;;  %v740_v63 = vsel %vm329_vm2, %v3860_v58, -inf }
 0x306   :  { %741 = vmax.xlane.f32.xlu0 %v740_v63  ;;  %v716_v5 = vpop.f32.mrb[26].mxu1  ;;  %v3005_v6 = vpop.f32.mrb[11].mxu0 }
 0x307   :  { %v3011_v7 = vpop.f32.mrb[27].mxu1 }
 0x316   :  { %203 = vrot.lane.b32.xlu1 %v3770_v14, %s3604_s15 }
 0x323   :  { %v724_v8 = vpop.xlane.xlu1 %723 }
 0x324   :  { %v744_v31 = vsub.f32 %v3843_v32, %v724_v8 }
 0x326   :  { %v753_v34 = vmul.f32 1.442695, %v744_v31 }
 0x38a   :  { %v733_v9 = vpop.xlane.xlu1 %732 }
 0x38b   :  { %v747_v10 = vsub.f32 %v566_v47, %v733_v9 }
 0x38d   :  { %v759_v15 = vmul.f32 1.442695, %v747_v10 }
 0x38f   :  { %3406 = vpow2.f32 %v759_v15 }
 0x392   :  { %v739_v16 = vpop.xlane.xlu1 %738 }
 0x393   :  { %v749_v32 = vsub.f32 %v664_v57, %v739_v16 }
 0x396   :  { %v204_v17 = vpop.permute.xlu1 %203 }
 0x397   :  { %v244_v18 = vadd.f32 %v243_v23, %v204_v17  ;;  %v247_v19 = vadd.f32 %v246_v25, %v204_v17  ;;  %v721_v23 = vpop.xlane.xlu0 %720 }
 0x398   :  { %v743_v25 = vsub.f32 %v3839_v27, %v721_v23 }
 0x399   :  { %v3867_v20 = vpop.eup %3406  ;;  %v3272_v21 = vpack.i.bf16 %v247_v19, %v244_v18  ;;  %v815_v22 = vpack.c.bf16 %v244_v18, %v244_v18  ;;  %v816_v24 = vpack.c.bf16 %v247_v19, %v247_v19 }
 0x39a   :  { %v779_v26 = vsel %vm329_vm2, %v3867_v20, 0.0  ;;  %v751_v30 = vmul.f32 1.442695, %v743_v25 }
 0x39b   :  { %780 = vadd.xlane.f32.xlu1 %v779_v26  ;;  %3273 = vrot.lane.b32.xlu0 %v3272_v21, %s3614_s17  ;;  %v828_v14 = vsel %vm826_vm3, %v815_v22, 0  ;;  %v874_v28 = vsel %vm826_vm3, %v816_v24, 0  ;;  %v727_v29 = vpop.xlane.xlu0 %726 }
 0x39c   :  { %3013 = vmatpush3.bf16.msra.mxu0 %v828_v14  ;;  %3019 = vmatpush3.bf16.msra.mxu1 %v874_v28  ;;  %3408 = vpow2.f32 %v751_v30  ;;  %v745_v35 = vsub.f32 %v3847_v37, %v727_v29  ;;  %v763_v37 = vmul.f32 1.442695, %v749_v32 }
 0x39d   :  { %3024 = vmatprep.subr.bf16.mxu0 %v3611_v0  ;;  %3030 = vmatprep.subr.bf16.mxu1 %v3611_v0  ;;  %3410 = vpow2.f32 %v753_v34 }
 0x39e   :  { %v755_v36 = vmul.f32 1.442695, %v745_v35 }
 0x39f   :  { %v730_v33 = vpop.xlane.xlu0 %729 }
 0x3a0   :  { %v746_v39 = vsub.f32 %v3849_v38, %v730_v33  ;;  %3412 = vpow2.f32 %v755_v36 }
 0x3a2   :  { %v757_v41 = vmul.f32 1.442695, %v746_v39 }
 0x3a3   :  { %v736_v40 = vpop.xlane.xlu0 %735 }
 0x3a4   :  { %v748_v27 = vsub.f32 %v3855_v48, %v736_v40  ;;  %3414 = vpow2.f32 %v757_v41 }
 0x3a6   :  { %v3409_v42 = vpop.eup %3408  ;;  %v761_v43 = vmul.f32 1.442695, %v748_v27 }
 0x3a7   :  { %v742_v44 = vpop.xlane.xlu0 %741  ;;  %v767_v45 = vsel %vm329_vm2, %v3409_v42, 0.0  ;;  %v3411_v46 = vpop.eup %3410 }
 0x3a8   :  { %3416 = vpow2.f32 %v761_v43  ;;  %v750_v47 = vsub.f32 %v3860_v58, %v742_v44  ;;  %v770_v38 = vsel %vm329_vm2, %v3411_v46, 0.0 }
 0x3a9   :  { %3418 = vpow2.f32 %v763_v37 }
 0x3aa   :  { %v3413_v49 = vpop.eup %3412  ;;  %v765_v50 = vmul.f32 1.442695, %v750_v47 }
 0x3ab   :  { %v773_v48 = vsel %vm329_vm2, %v3413_v49, 0.0 }
 0x3ac   :  { %3283 = vrot.lane.b32.xlu1 %v3272_v21, %s3613_s0  ;;  %3420 = vpow2.f32 %v765_v50 }
 0x3ae   :  { %v3415_v51 = vpop.eup %3414 }
 0x3af   :  { %v776_v52 = vsel %vm329_vm2, %v3415_v51, 0.0 }
 0x3b0   :  { %1231 = vrot.lane.b32.xlu1 %v3741_v2, %s3617_s21 }
 0x3b2   :  { %v3887_v53 = vpop.eup %3416 }
 0x3b3   :  { %v782_v54 = vsel %vm329_vm2, %v3887_v53, 0.0  ;;  %v3891_v55 = vpop.eup %3418 }
 0x3b4   :  { %v785_v56 = vsel %vm329_vm2, %v3891_v55, 0.0 }
 0x3b6   :  { %v3895_v57 = vpop.eup %3420 }
 0x3b7   :  { %v788_v58 = vsel %vm329_vm2, %v3895_v57, 0.0 }
 0x3ba   :  { %768 = vadd.xlane.f32.xlu0 %v767_v45 }
 0x3be   :  { %771 = vadd.xlane.f32.xlu0 %v770_v38 }
 0x3c2   :  { %774 = vadd.xlane.f32.xlu0 %v773_v48 }
 0x3c6   :  { %777 = vadd.xlane.f32.xlu0 %v776_v52 }
 0x3ca   :  { %783 = vadd.xlane.f32.xlu0 %v782_v54 }
 0x3ce   :  { %786 = vadd.xlane.f32.xlu0 %v785_v56 }
 0x3d2   :  { %789 = vadd.xlane.f32.xlu0 %v788_v58 }
 0x3e8   :  { %3278 = vrot.lane.b32.xlu0 %v3272_v21, %s3615_s18 }
 0x3ec   :  { %1229 = vrot.lane.b32.xlu0 %v3739_v1, %s3617_s21 }
 0x40d   :  { %v3274_v59 = vpop.permute.xlu0 %3273 }
 0x40e   :  { %v3275_v62 = vunpack.i.l.bf16 %v3274_v59  ;;  %v3276_v6 = vunpack.i.h.bf16 %v3274_v59 }
 0x410   :  { %v817_v7 = vpack.c.bf16 %v3275_v62, %v3275_v62  ;;  %v818_v17 = vpack.c.bf16 %v3276_v6, %v3276_v6 }
 0x412   :  { %v920_v21 = vsel %vm826_vm3, %v817_v7, 0  ;;  %v966_v28 = vsel %vm826_vm3, %v818_v17, 0 }
 0x428   :  { %v781_v10 = vpop.xlane.xlu1 %780 }
 0x42c   :  { %v3284_v31 = vpop.permute.xlu1 %3283 }
 0x42d   :  { %v3286_v39 = vunpack.i.h.bf16 %v3284_v31  ;;  %v3285_v40 = vunpack.i.l.bf16 %v3284_v31 }
 0x42f   :  { %v822_v45 = vpack.c.bf16 %v3286_v39, %v3286_v39 }
 0x447   :  { %v769_v60 = vpop.xlane.xlu0 %768 }
 0x448   :  { %3422 = vrcp.f32 %v769_v60 }
 0x44b   :  { %v772_v61 = vpop.xlane.xlu0 %771 }
 0x44c   :  { %3424 = vrcp.f32 %v772_v61 }
 0x44f   :  { %v775_v63 = vpop.xlane.xlu0 %774 }
 0x450   :  { %3426 = vrcp.f32 %v775_v63 }
 0x452   :  { %v3423_v5 = vpop.eup %3422 }
 0x453   :  { %v799_v8 = vmul.f32 %v3423_v5, %v3409_v42  ;;  %v778_v9 = vpop.xlane.xlu0 %777 }
 0x454   :  { %3428 = vrcp.f32 %v778_v9 }
 0x455   :  { %v807_v15 = vpack.c.bf16 %v799_v8, %v799_v8  ;;  %3430 = vrcp.f32 %v781_v10 }
 0x456   :  { %v3425_v16 = vpop.eup %3424 }
 0x457   :  { %v800_v18 = vmul.f32 %v3425_v16, %v3411_v46  ;;  %3015 = vmatmul.mubr.msk.bf16.vlgmr.msra.gmra.mrb[12].mxu0 %vm329_vm2, %v807_v15  ;;  %v784_v19 = vpop.xlane.xlu0 %783  ;;  %v821_v46 = vpack.c.bf16 %v3285_v40, %v3285_v40 }
 0x458   :  { %3025 = vmatpush3.bf16.msra.mxu0 %v920_v21  ;;  %3026 = vmatprep.mubr.msk.bf16.mxu0 %vm3612_vm0, %v3611_v0  ;;  %3432 = vrcp.f32 %v784_v19 }
 0x459   :  { %v808_v22 = vpack.c.bf16 %v800_v18, %v800_v18  ;;  %3036 = vmatprep.subr.bf16.mxu0 %v3611_v0  ;;  %v1104_v48 = vsel %vm826_vm3, %v821_v46, 0 }
 0x45a   :  { %v3427_v24 = vpop.eup %3426 }
 0x45b   :  { %v801_v26 = vmul.f32 %v3427_v24, %v3413_v49  ;;  %3021 = vmatmul.mubr.msk.bf16.vlgmr.msra.gmra.mrb[28].mxu1 %vm329_vm2, %v808_v22  ;;  %v787_v14 = vpop.xlane.xlu0 %786 }
 0x45c   :  { %3031 = vmatpush3.bf16.msra.mxu1 %v966_v28  ;;  %3032 = vmatprep.mubr.msk.bf16.mxu1 %vm3612_vm0, %v3611_v0  ;;  %3434 = vrcp.f32 %v787_v14 }
 0x45d   :  { %v809_v23 = vpack.c.bf16 %v801_v26, %v801_v26  ;;  %3042 = vmatprep.subr.bf16.mxu1 %v3611_v0 }
 0x45e   :  { %v3429_v25 = vpop.eup %3428 }
 0x45f   :  { %v802_v29 = vmul.f32 %v3429_v25, %v3415_v51  ;;  %v790_v30 = vpop.xlane.xlu0 %789  ;;  %3027 = vmatmul.mubr.msk.bf16.vlgmr.msra.gmra.mrb[16].mxu0 %vm329_vm2, %v809_v23  ;;  %v3431_v34 = vpop.eup %3430  ;;  %v1150_v51 = vsel %vm826_vm3, %v822_v45, 0 }
 0x460   :  { %3038 = vmatprep.mubr.msk.bf16.mxu0 %vm3612_vm0, %v3611_v0  ;;  %3436 = vrcp.f32 %v790_v30  ;;  %v803_v42 = vmul.f32 %v3431_v34, %v3867_v20  ;;  %v1232_v23 = vpop.permute.xlu1 %1231 }
 0x461   :  { %v810_v33 = vpack.c.bf16 %v802_v29, %v802_v29 }
 0x462   :  { %v3433_v35 = vpop.eup %3432  ;;  %v811_v49 = vpack.c.bf16 %v803_v42, %v803_v42 }
 0x463   :  { %v3279_v36 = vpop.permute.xlu0 %3278  ;;  %3033 = vmatmul.mubr.msk.bf16.vlgmr.msra.gmra.mrb[32].mxu1 %vm329_vm2, %v810_v33  ;;  %v804_v43 = vmul.f32 %v3433_v35, %v3887_v53 }
 0x464   :  { %v3281_v41 = vunpack.i.h.bf16 %v3279_v36  ;;  %v3280_v27 = vunpack.i.l.bf16 %v3279_v36  ;;  %3044 = vmatprep.mubr.msk.bf16.mxu1 %vm3612_vm0, %v3611_v0 }
 0x465   :  { %v812_v50 = vpack.c.bf16 %v804_v43, %v804_v43 }
 0x466   :  { %v820_v32 = vpack.c.bf16 %v3281_v41, %v3281_v41  ;;  %v819_v44 = vpack.c.bf16 %v3280_v27, %v3280_v27  ;;  %v3435_v38 = vpop.eup %3434 }
 0x467   :  { %v805_v52 = vmul.f32 %v3435_v38, %v3891_v55  ;;  %v1230_v55 = vpop.permute.xlu0 %1229 }
 0x468   :  { %v1012_v37 = vsel %vm826_vm3, %v819_v44, 0  ;;  %v1058_v47 = vsel %vm826_vm3, %v820_v32, 0 }
 0x469   :  { %3037 = vmatpush3.bf16.msra.mxu0 %v1012_v37  ;;  %3043 = vmatpush3.bf16.msra.mxu1 %v1058_v47  ;;  %v813_v54 = vpack.c.bf16 %v805_v52, %v805_v52 }
 0x46a   :  { %3048 = vmatprep.subr.bf16.mxu0 %v3611_v0  ;;  %3054 = vmatprep.subr.bf16.mxu1 %v3611_v0  ;;  %v3437_v20 = vpop.eup %3436 }
 0x46b   :  { %v806_v53 = vmul.f32 %v3437_v20, %v3895_v57 }
 0x46c   :  { %3039 = vmatmul.mubr.msk.bf16.vlgmr.msra.gmra.mrb[20].mxu0 %vm329_vm2, %v811_v49  ;;  %3045 = vmatmul.mubr.msk.bf16.vlgmr.msra.gmra.mrb[36].mxu1 %vm329_vm2, %v812_v50 }
 0x46d   :  { %3049 = vmatpush3.bf16.msra.mxu0 %v1104_v48  ;;  %3055 = vmatpush3.bf16.msra.mxu1 %v1150_v51  ;;  %v814_v56 = vpack.c.bf16 %v806_v53, %v806_v53  ;;  %v1227_v51 = vsub.s32 2, %v3762_v11 }
 0x46e   :  { %3050 = vmatprep.mubr.msk.bf16.mxu0 %vm3612_vm0, %v3611_v0  ;;  %3056 = vmatprep.mubr.msk.bf16.mxu1 %vm3612_vm0, %v3611_v0 }
 0x46f   :  { %3060 = vmatprep.subr.bf16.mxu0 %v3611_v0  ;;  %3068 = vmatprep.subr.bf16.mxu1 %v3611_v0  ;;  %v1228_v52 = vrot.slane %v3765_v13, %v1227_v51 }
 0x474   :  { %3051 = vmatmul.mubr.msk.bf16.vlgmr.msra.gmra.mrb[24].mxu0 %vm329_vm2, %v813_v54  ;;  %3057 = vmatmul.mubr.msk.bf16.vlgmr.msra.gmra.mrb[40].mxu1 %vm329_vm2, %v814_v56 }
 0x475   :  { %3064 = vmatprep.mubr.msk.bf16.mxu0 %vm3612_vm0, %v3611_v0  ;;  %3072 = vmatprep.mubr.msk.bf16.mxu1 %vm3612_vm0, %v3611_v0 }
 0x476   :  { %3061 = vmatpush3.bf16.msra.mxu0 %v1230_v55 }
 0x477   :  { %3062 = vmatprep.subr.bf16.mxu0 %v3611_v0 }
 0x47a   :  { %3063 = vmatpush3.bf16.msra.mxu0 %v1232_v23 }
 0x52a   :  { %v864_v57 = vpop.f32.mrb[12].mxu0 }
 0x52b   :  { %v3016_v58 = vpop.f32.mrb[13].mxu0 }
 0x52c   :  { %v867_v59 = vpop.f32.mrb[14].mxu0 }
 0x52d   :  { %v3017_v60 = vpop.f32.mrb[15].mxu0 }
 0x52e   :  { %v910_v61 = vpop.f32.mrb[28].mxu1 }
 0x52f   :  { %v3022_v62 = vpop.f32.mrb[29].mxu1 }
 0x530   :  { %v913_v63 = vpop.f32.mrb[30].mxu1 }
 0x531   :  { %v3023_v5 = vpop.f32.mrb[31].mxu1  ;;  %v3963_v63 = vld [vmem:[#allocation5 + $0x10] sm:$0xff]  }
 0x532   :  { %v956_v6 = vpop.f32.mrb[16].mxu0  ;;  %3069 = vmatpush3.bf16.msra.mxu1 %v3963_v63  ;;  %v3969_v5 = vld [vmem:[#allocation5 + $0x18] sm:$0xff]  }
 0x533   :  { %v3028_v7 = vpop.f32.mrb[17].mxu0  ;;  %3070 = vmatprep.subr.bf16.mxu1 %v3611_v0 }
 0x534   :  { %v959_v8 = vpop.f32.mrb[18].mxu0 }
 0x535   :  { %v3029_v9 = vpop.f32.mrb[19].mxu0 }
 0x536   :  { %v1002_v1 = vpop.f32.mrb[32].mxu1  ;;  %3071 = vmatpush3.bf16.msra.mxu1 %v3969_v5 }
 0x537   :  { %v3287_v10 = vpack.i.bf16 %v1002_v1, %v956_v6  ;;  %v3034_v15 = vpop.f32.mrb[33].mxu1 }
 0x538   :  { %v1005_v2 = vpop.f32.mrb[34].mxu1 }
 0x539   :  { %3288 = vrot.lane.b32.xlu0 %v3287_v10, %s3608_s28  ;;  %v3035_v16 = vpop.f32.mrb[35].mxu1 }
 0x53f   :  { %v1048_v17 = vpop.f32.mrb[20].mxu0  ;;  %v1094_v18 = vpop.f32.mrb[36].mxu1 }
 0x540   :  { %v3292_v19 = vpack.i.bf16 %v1094_v18, %v1048_v17  ;;  %v3040_v21 = vpop.f32.mrb[21].mxu0  ;;  %v3046_v22 = vpop.f32.mrb[37].mxu1  ;;  %v90_v17 = vld [vmem:[%s4309_s2] sm:$0xff]  ;;  %v91_v18 = vld [vmem:[%s4309_s2 + $0x8] sm:$0xff] }
 0x541   :  { %v1051_v24 = vpop.f32.mrb[22].mxu0  ;;  %v1097_v26 = vpop.f32.mrb[38].mxu1  ;;  %v1325_v21 = vsub.s32 1, %v3762_v11 }
 0x542   :  { %v3041_v14 = vpop.f32.mrb[23].mxu0  ;;  %3293 = vrot.lane.b32.xlu0 %v3292_v19, %s3618_s22  ;;  %v3047_v28 = vpop.f32.mrb[39].mxu1  ;;  %v1385_v19 = vpack.c.bf16 %v91_v18, %v90_v17 }
 0x543   :  { %v3989_v22 = vrot.slane %v3765_v13, %v1325_v21 }
 0x547   :  { %v1140_v25 = vpop.f32.mrb[24].mxu0  ;;  %v1186_v29 = vpop.f32.mrb[40].mxu1 }
 0x548   :  { %v3297_v30 = vpack.i.bf16 %v1186_v29, %v1140_v25  ;;  %v3052_v31 = vpop.f32.mrb[25].mxu0  ;;  %v3058_v33 = vpop.f32.mrb[41].mxu1  ;;  %v92_v25 = vld [vmem:[%s4309_s2 + $0x10] sm:$0xff]  ;;  %v93_v29 = vld [vmem:[%s4309_s2 + $0x18] sm:$0xff] }
 0x549   :  { %v1143_v34 = vpop.f32.mrb[26].mxu0  ;;  %v1189_v35 = vpop.f32.mrb[42].mxu1  ;;  %v1386_v33 = vpack.c.bf16 %v93_v29, %v92_v25 }
 0x54a   :  { %v3053_v36 = vpop.f32.mrb[27].mxu0  ;;  %3298 = vrot.lane.b32.xlu0 %v3297_v30, %s3619_s23  ;;  %v3059_v39 = vpop.f32.mrb[43].mxu1  ;;  %v1310_v34 = vsub.s32 5, %v3762_v11 }
 0x54b   :  { %v1316_v36 = vsub.s32 6, %v3762_v11 }
 0x54c   :  { %v1311_v35 = vrot.slane %v3765_v13, %v1310_v34 }
 0x5ab   :  { %v3289_v40 = vpop.permute.xlu0 %3288 }
 0x5ac   :  { %v3291_v27 = vunpack.i.h.bf16 %v3289_v40  ;;  %v3290_v42 = vunpack.i.l.bf16 %v3289_v40 }
 0x5ae   :  { %v1217_v45 = vsel %vm329_vm2, %v910_v61, %v3291_v27  ;;  %v1216_v46 = vsel %vm329_vm2, %v864_v57, %v3290_v42  ;;  %v1317_v27 = vrot.slane %v3765_v13, %v1316_v36  ;;  %v94_v13 = vld [vmem:[%s4310_s3] sm:$0xff] }
 0x5b4   :  { %v3294_v41 = vpop.permute.xlu0 %3293 }
 0x5b5   :  { %v3296_v43 = vunpack.i.h.bf16 %v3294_v41  ;;  %v3295_v32 = vunpack.i.l.bf16 %v3294_v41 }
 0x5b7   :  { %v1220_v38 = vsel %vm1218_vm4, %v1217_v45, %v3296_v43  ;;  %v1219_v49 = vsel %vm1218_vm4, %v1216_v46, %v3295_v32 }
 0x5bc   :  { %v3299_v44 = vpop.permute.xlu0 %3298 }
 0x5bd   :  { %v3301_v37 = vunpack.i.h.bf16 %v3299_v44  ;;  %v3300_v47 = vunpack.i.l.bf16 %v3299_v44 }
 0x5bf   :  { %v1223_v50 = vsel %vm1221_vm5, %v1220_v38, %v3301_v37  ;;  %v1222_v20 = vsel %vm1221_vm5, %v1219_v49, %v3300_v47  ;;  %v3482_v47 = vld [vmem:[#allocation2] sm:$0xff]  ;;  %v3483_v49 = vld [vmem:[#allocation2 + $0x8] sm:$0xff] }
 0x5c0   :  { %v1224_v48 = vpack.c.bf16 %v1223_v50, %v1222_v20 }
 0x5c2   :  { %3065 = vmatmul.mubr.msk.bf16.vlgmr.msra.gmra.mrb[28].mxu0 %vm148_vm1, %v1224_v48 }
 0x5c3   :  { %3080 = vmatprep.mubr.msk.bf16.mxu0 %vm148_vm1, %v1385_v19 }
 0x695   :  { %v1272_v53 = vpop.f32.mrb[28].mxu0 }
 0x696   :  { %v1273_v54 = vadd.f32 %v1272_v53, %v1228_v52  ;;  %v3066_v56 = vpop.f32.mrb[29].mxu0 }
 0x697   :  { %v1275_v55 = vpop.f32.mrb[30].mxu0  ;;  %v97_v56 = vld [vmem:[%s4310_s3 + $0x18] sm:$0xff] }
 0x698   :  { %v1276_v57 = vadd.f32 %v1275_v55, %v1228_v52  ;;  %v3067_v58 = vpop.f32.mrb[31].mxu0  ;;  %v1279_v59 = vadd.f32 %v1273_v54, %v3747_v3  ;;  %v95_v52 = vld [vmem:[%s4310_s3 + $0x8] sm:$0xff]  ;;  %v96_v54 = vld [vmem:[%s4310_s3 + $0x10] sm:$0xff] }
 0x699   :  { %v1452_v53 = vpack.c.bf16 %v95_v52, %v94_v13  ;;  %v1453_v55 = vpack.c.bf16 %v97_v56, %v96_v54 }
 0x69a   :  { %v1281_v60 = vsel %vm148_vm1, %v1279_v59, 0.0  ;;  %v1280_v61 = vadd.f32 %v1276_v57, %v3752_v4 }
 0x69b   :  { %1282 = vadd.xlane.f32.xlu0 %v1281_v60 }
 0x69c   :  { %v1284_v62 = vsel %vm148_vm1, %v1280_v61, 0.0 }
 0x69d   :  { %1285 = vadd.xlane.f32.xlu1 %v1284_v62 }
 0x6ae   :  { %1387 = vrot.lane.b32.xlu1 %v3963_v63, %s3616_s19 }
 0x6b2   :  { %1394 = vrot.lane.b32.xlu1 %v3989_v22, %s3616_s19 }
 0x6b6   :  { %1454 = vrot.lane.b32.xlu1 %v3963_v63, %s3604_s15 }
 0x728   :  { %v1283_v3 = vpop.xlane.xlu0 %1282 }
 0x729   :  { %v1288_v6 = vmul.f32 0.03125, %v1283_v3 }
 0x72a   :  { %v1286_v4 = vpop.xlane.xlu1 %1285 }
 0x72b   :  { %v1290_v7 = vsub.f32 %v1279_v59, %v1288_v6  ;;  %v1289_v8 = vmul.f32 0.03125, %v1286_v4 }
 0x72d   :  { %v1291_v9 = vsub.f32 %v1280_v61, %v1289_v8  ;;  %v1292_v1 = vmul.f32 %v1290_v7, %v1290_v7 }
 0x72e   :  { %v1388_v16 = vpop.permute.xlu1 %1387 }
 0x72f   :  { %v1294_v10 = vsel %vm148_vm1, %v1292_v1, 0.0  ;;  %v1293_v15 = vmul.f32 %v1291_v9, %v1291_v9  ;;  %3076 = vmatprep.subr.bf16.mxu0 %v1388_v16 }
 0x730   :  { %1295 = vadd.xlane.f32.xlu0 %v1294_v10  ;;  %3077 = vmatpush3.bf16.msra.mxu0 %v1388_v16 }
 0x731   :  { %v1297_v2 = vsel %vm148_vm1, %v1293_v15, 0.0 }
 0x732   :  { %v1395_v32 = vpop.permute.xlu1 %1394 }
 0x734   :  { %1298 = vadd.xlane.f32.xlu0 %v1297_v2 }
 0x736   :  { %v1455_v37 = vpop.permute.xlu1 %1454 }
 0x737   :  { %3084 = vmatprep.subr.bf16.mxu1 %v1455_v37 }
 0x74a   :  { %1389 = vrot.lane.b32.xlu0 %v3969_v5, %s3616_s19 }
 0x74e   :  { %1456 = vrot.lane.b32.xlu0 %v3969_v5, %s3604_s15 }
 0x7bd   :  { %v1296_v24 = vpop.xlane.xlu0 %1295 }
 0x7be   :  { %v1300_v26 = vmul.f32 0.03125, %v1296_v24 }
 0x7c0   :  { %v1302_v14 = vadd.f32 1e-05, %v1300_v26 }
 0x7c1   :  { %v1299_v28 = vpop.xlane.xlu0 %1298 }
 0x7c2   :  { %3438 = vrsqrt.f32 %v1302_v14  ;;  %v1301_v23 = vmul.f32 0.03125, %v1299_v28 }
 0x7c4   :  { %v1303_v30 = vadd.f32 1e-05, %v1301_v23 }
 0x7c5   :  { %v1390_v31 = vpop.permute.xlu0 %1389 }
 0x7c6   :  { %3440 = vrsqrt.f32 %v1303_v30  ;;  %3078 = vmatprep.subr.bf16.mxu0 %v1390_v31 }
 0x7c7   :  { %3079 = vmatpush3.bf16.msra.mxu0 %v1390_v31 }
 0x7c8   :  { %3092 = vmatprep.subr.bf16.mxu0 %v3611_v0 }
 0x7c9   :  { %v1457_v48 = vpop.permute.xlu0 %1456 }
 0x7ca   :  { %3081 = vmatmul.mubr.msk.bf16.vlgmr.msra.gmra.mrb[32].mxu0 %vm148_vm1, %v1386_v33 }
 0x7cb   :  { %3094 = vmatprep.mubr.msk.bf16.mxu0 %vm3612_vm0, %v3611_v0 }
 0x7cc   :  { %v3439_v39 = vpop.eup %3438 }
 0x7cd   :  { %v1306_v40 = vmul.f32 %v3439_v39, %v1290_v7 }
 0x7cf   :  { %v1312_v41 = vmul.f32 %v1311_v35, %v1306_v40 }
 0x7d0   :  { %v3441_v42 = vpop.eup %3440 }
 0x7d1   :  { %v1307_v43 = vmul.f32 %v3441_v42, %v1291_v9  ;;  %v4009_v45 = vadd.f32 %v1317_v27, %v1312_v41 }
 0x7d3   :  { %v1313_v44 = vmul.f32 %v1311_v35, %v1307_v43  ;;  %v1320_v38 = vadd.f32 %v3482_v47, %v4009_v45 }
 0x7d5   :  { %v4011_v46 = vadd.f32 %v1317_v27, %v1313_v44 }
 0x7d7   :  { %v1321_v50 = vadd.f32 %v3483_v49, %v4011_v46 }
 0x7d9   :  { %v1322_v20 = vpack.c.bf16 %v1321_v50, %v1320_v38 }
 0x7db   :  { %3073 = vmatmul.mubr.msk.bf16.vlgmr.msra.gmra.mrb[44].mxu1 %vm148_vm1, %v1322_v20 }
 0x7dc   :  { %3085 = vmatpush3.bf16.msra.mxu1 %v1455_v37  ;;  %3088 = vmatprep.mubr.msk.bf16.mxu1 %vm148_vm1, %v1452_v53 }
 0x7dd   :  { %3086 = vmatprep.subr.bf16.mxu1 %v1457_v48 }
 0x7e0   :  { %3087 = vmatpush3.bf16.msra.mxu1 %v1457_v48 }
 0x7e1   :  { %3098 = vmatprep.subr.bf16.mxu1 %v3611_v0 }
 0x7e3   :  { %3089 = vmatmul.mubr.msk.bf16.vlgmr.msra.gmra.mrb[48].mxu1 %vm148_vm1, %v1453_v55 }
 0x7e4   :  { %3100 = vmatprep.mubr.msk.bf16.mxu1 %vm3612_vm0, %v3611_v0 }
 0x89d   :  { %v3082_v57 = vpop.f32.mrb[32].mxu0 }
 0x89e   :  { %v1446_v58 = vadd.f32 %v3082_v57, %v1395_v32  ;;  %v1437_v59 = vpop.f32.mrb[33].mxu0 }
 0x89f   :  { %v1438_v60 = vadd.f32 %v1437_v59, %v1395_v32  ;;  %v3083_v61 = vpop.f32.mrb[34].mxu0 }
 0x8a0   :  { %v1449_v62 = vadd.f32 %v3083_v61, %v1395_v32  ;;  %v1440_v3 = vpop.f32.mrb[35].mxu0 }
 0x8a1   :  { %v1441_v6 = vadd.f32 %v1440_v3, %v1395_v32 }
 0x8a2   :  { %v3307_v4 = vpack.i.bf16 %v1449_v62, %v1446_v58  ;;  %v1627_v7 = vpack.c.bf16 %v1449_v62, %v1446_v58 }
 0x8a3   :  { %v3302_v8 = vpack.i.bf16 %v1441_v6, %v1438_v60  ;;  %v1626_v9 = vpack.c.bf16 %v1441_v6, %v1438_v60 }
 0x8a4   :  { %3308 = vrot.lane.b32.xlu0 %v3307_v4, %s3614_s17  ;;  %v1684_v1 = vsel %vm329_vm2, %v1627_v7, 0 }
 0x8a5   :  { %3303 = vrot.lane.b32.xlu1 %v3302_v8, %s3614_s17  ;;  %v1638_v10 = vsel %vm329_vm2, %v1626_v9, 0  ;;  %3099 = vmatpush3.bf16.xpose.msra.mxu1 %v1684_v1 }
 0x8a6   :  { %3093 = vmatpush3.bf16.xpose.msra.mxu0 %v1638_v10  ;;  %3110 = vmatprep.subr.bf16.mxu1 %v3611_v0 }
 0x8a7   :  { %3104 = vmatprep.subr.bf16.mxu0 %v3611_v0 }
 0x8a8   :  { %3313 = vrot.lane.b32.xlu0 %v3302_v8, %s3615_s18 }
 0x8ae   :  { %v1376_v15 = vpop.f32.mrb[44].mxu1 }
 0x8af   :  { %v1377_v2 = vadd.f32 %v1376_v15, %v3989_v22  ;;  %v3074_v16 = vpop.f32.mrb[45].mxu1 }
 0x8b0   :  { %v1379_v17 = vpop.f32.mrb[46].mxu1 }
 0x8b1   :  { %v1383_v18 = vmul.f32 0.35355338, %v1377_v2  ;;  %v1380_v19 = vadd.f32 %v1379_v17, %v3989_v22  ;;  %v3075_v24 = vpop.f32.mrb[47].mxu1 }
 0x8b3   :  { %v1618_v26 = vpack.c.bf16 %v1383_v18, %v1383_v18  ;;  %v1384_v14 = vmul.f32 0.35355338, %v1380_v19 }
 0x8b5   :  { %v1619_v28 = vpack.c.bf16 %v1384_v14, %v1384_v14  ;;  %3095 = vmatmul.mubr.msk.bf16.vlgmr.msra.gmra.mrb[36].mxu0 %vm329_vm2, %v1618_v26  ;;  %v3332_v23 = vpack.i.bf16 %v1384_v14, %v1383_v18 }
 0x8b6   :  { %3106 = vmatprep.mubr.msk.bf16.mxu0 %vm3612_vm0, %v3611_v0  ;;  %v4054_v25 = vpop.f32.mrb[48].mxu1 }
 0x8b7   :  { %3333 = vrot.lane.b32.xlu0 %v3332_v23, %s3615_s18  ;;  %3318 = vrot.lane.b32.xlu1 %v3332_v23, %s3614_s17  ;;  %v4056_v29 = vpop.f32.mrb[49].mxu1 }
 0x8b8   :  { %3101 = vmatmul.mubr.msk.bf16.vlgmr.msra.gmra.mrb[52].mxu1 %vm329_vm2, %v1619_v28  ;;  %v4058_v30 = vpop.f32.mrb[50].mxu1 }
 0x8b9   :  { %3112 = vmatprep.mubr.msk.bf16.mxu1 %vm3612_vm0, %v3611_v0  ;;  %v4060_v31 = vpop.f32.mrb[51].mxu1 }
 0x8bb   :  { %3338 = vrot.lane.b32.xlu0 %v3307_v4, %s3613_s0  ;;  %3323 = vrot.lane.b32.xlu1 %v3307_v4, %s3615_s18 }
 0x8bf   :  { %3328 = vrot.lane.b32.xlu1 %v3302_v8, %s3613_s0 }
 0x8c3   :  { %3343 = vrot.lane.b32.xlu1 %v3332_v23, %s3613_s0 }
 0x916   :  { %v3309_v33 = vpop.permute.xlu0 %3308 }
 0x917   :  { %v3311_v34 = vunpack.i.h.bf16 %v3309_v33  ;;  %v3310_v35 = vunpack.i.l.bf16 %v3309_v33  ;;  %v3304_v36 = vpop.permute.xlu1 %3303 }
 0x918   :  { %v3306_v39 = vunpack.i.h.bf16 %v3304_v36  ;;  %v3305_v40 = vunpack.i.l.bf16 %v3304_v36 }
 0x919   :  { %v1629_v41 = vpack.c.bf16 %v3311_v34, %v3310_v35 }
 0x91a   :  { %v1628_v27 = vpack.c.bf16 %v3306_v39, %v3305_v40  ;;  %v3314_v32 = vpop.permute.xlu0 %3313 }
 0x91b   :  { %v1776_v42 = vsel %vm329_vm2, %v1629_v41, 0  ;;  %v3316_v44 = vunpack.i.h.bf16 %v3314_v32  ;;  %v3315_v37 = vunpack.i.l.bf16 %v3314_v32 }
 0x91c   :  { %v1730_v43 = vsel %vm329_vm2, %v1628_v27, 0  ;;  %3111 = vmatpush3.bf16.xpose.msra.mxu1 %v1776_v42 }
 0x91d   :  { %3105 = vmatpush3.bf16.xpose.msra.mxu0 %v1730_v43  ;;  %3122 = vmatprep.subr.bf16.mxu1 %v3611_v0  ;;  %v1630_v49 = vpack.c.bf16 %v3316_v44, %v3315_v37 }
 0x91e   :  { %3116 = vmatprep.subr.bf16.mxu0 %v3611_v0 }
 0x91f   :  { %v1822_v55 = vsel %vm329_vm2, %v1630_v49, 0 }
 0x929   :  { %v3334_v47 = vpop.permute.xlu0 %3333  ;;  %v3319_v38 = vpop.permute.xlu1 %3318 }
 0x92a   :  { %v3321_v50 = vunpack.i.h.bf16 %v3319_v38  ;;  %v3320_v20 = vunpack.i.l.bf16 %v3319_v38  ;;  %v3335_v57 = vunpack.i.l.bf16 %v3334_v47  ;;  %v3336_v4 = vunpack.i.h.bf16 %v3334_v47 }
 0x92c   :  { %v1621_v48 = vpack.c.bf16 %v3321_v50, %v3321_v50  ;;  %v1620_v13 = vpack.c.bf16 %v3320_v20, %v3320_v20  ;;  %v1622_v7 = vpack.c.bf16 %v3335_v57, %v3335_v57  ;;  %v1623_v15 = vpack.c.bf16 %v3336_v4, %v3336_v4 }
 0x92d   :  { %v3324_v52 = vpop.permute.xlu1 %3323  ;;  %v3339_v53 = vpop.permute.xlu0 %3338 }
 0x92e   :  { %v3326_v54 = vunpack.i.h.bf16 %v3324_v52  ;;  %v3325_v56 = vunpack.i.l.bf16 %v3324_v52  ;;  %3107 = vmatmul.mubr.msk.bf16.vlgmr.msra.gmra.mrb[40].mxu0 %vm329_vm2, %v1620_v13  ;;  %3113 = vmatmul.mubr.msk.bf16.vlgmr.msra.gmra.mrb[56].mxu1 %vm329_vm2, %v1621_v48  ;;  %v3341_v59 = vunpack.i.h.bf16 %v3339_v53  ;;  %v3340_v61 = vunpack.i.l.bf16 %v3339_v53 }
 0x92f   :  { %3117 = vmatpush3.bf16.xpose.msra.mxu0 %v1822_v55  ;;  %3118 = vmatprep.mubr.msk.bf16.mxu0 %vm3612_vm0, %v3611_v0 }
 0x930   :  { %v1631_v58 = vpack.c.bf16 %v3326_v54, %v3325_v56  ;;  %3128 = vmatprep.subr.bf16.mxu0 %v3611_v0  ;;  %3124 = vmatprep.mubr.msk.bf16.mxu1 %vm3612_vm0, %v3611_v0  ;;  %v1633_v1 = vpack.c.bf16 %v3341_v59, %v3340_v61 }
 0x931   :  { %v3329_v60 = vpop.permute.xlu1 %3328 }
 0x932   :  { %v3331_v62 = vunpack.i.h.bf16 %v3329_v60  ;;  %v3330_v3 = vunpack.i.l.bf16 %v3329_v60  ;;  %v1868_v6 = vsel %vm329_vm2, %v1631_v58, 0  ;;  %v1960_v16 = vsel %vm329_vm2, %v1633_v1, 0 }
 0x933   :  { %3123 = vmatpush3.bf16.xpose.msra.mxu1 %v1868_v6 }
 0x934   :  { %v1632_v8 = vpack.c.bf16 %v3331_v62, %v3330_v3  ;;  %3134 = vmatprep.subr.bf16.mxu1 %v3611_v0 }
 0x935   :  { %v3344_v9 = vpop.permute.xlu1 %3343 }
 0x936   :  { %3119 = vmatmul.mubr.msk.bf16.vlgmr.msra.gmra.mrb[44].mxu0 %vm329_vm2, %v1622_v7  ;;  %v1914_v10 = vsel %vm329_vm2, %v1632_v8, 0  ;;  %v3345_v2 = vunpack.i.l.bf16 %v3344_v9  ;;  %v3346_v17 = vunpack.i.h.bf16 %v3344_v9 }
 0x937   :  { %3129 = vmatpush3.bf16.xpose.msra.mxu0 %v1914_v10  ;;  %3130 = vmatprep.mubr.msk.bf16.mxu0 %vm3612_vm0, %v3611_v0 }
 0x938   :  { %3140 = vmatprep.subr.bf16.mxu0 %v3611_v0  ;;  %v1624_v18 = vpack.c.bf16 %v3345_v2, %v3345_v2  ;;  %v1625_v19 = vpack.c.bf16 %v3346_v17, %v3346_v17 }
 0x93a   :  { %3125 = vmatmul.mubr.msk.bf16.vlgmr.msra.gmra.mrb[60].mxu1 %vm329_vm2, %v1623_v15 }
 0x93b   :  { %3135 = vmatpush3.bf16.xpose.msra.mxu1 %v1960_v16  ;;  %3136 = vmatprep.mubr.msk.bf16.mxu1 %vm3612_vm0, %v3611_v0 }
 0x93c   :  { %3146 = vmatprep.subr.bf16.mxu1 %v3611_v0 }
 0x93e   :  { %3131 = vmatmul.mubr.msk.bf16.vlgmr.msra.gmra.mrb[48].mxu0 %vm329_vm2, %v1624_v18 }
 0x93f   :  { %3142 = vmatprep.mubr.msk.bf16.mxu0 %vm3612_vm0, %v3611_v0 }
 0x942   :  { %3137 = vmatmul.mubr.msk.bf16.vlgmr.msra.gmra.mrb[64].mxu1 %vm329_vm2, %v1625_v19 }
 0x943   :  { %3148 = vmatprep.mubr.msk.bf16.mxu1 %vm3612_vm0, %v3611_v0 }
 0x988   :  { %v4092_v24 = vpop.f32.mrb[36].mxu0 }
 0x989   :  { %v3096_v26 = vpop.f32.mrb[37].mxu0  ;;  %v2002_v14 = vsel %vm1218_vm4, %v4092_v24, -inf }
 0x98a   :  { %v1677_v28 = vpop.f32.mrb[38].mxu0  ;;  %2003 = vmax.xlane.f32.xlu0 %v2002_v14 }
 0x98b   :  { %v4096_v23 = vpop.f32.mrb[52].mxu1  ;;  %v3097_v33 = vpop.f32.mrb[39].mxu0 }
 0x98c   :  { %v3102_v34 = vpop.f32.mrb[53].mxu1  ;;  %v2005_v35 = vsel %vm1218_vm4, %v4096_v23, -inf }
 0x98d   :  { %2006 = vmax.xlane.f32.xlu1 %v2005_v35  ;;  %v1723_v36 = vpop.f32.mrb[54].mxu1 }
 0x98e   :  { %v3103_v39 = vpop.f32.mrb[55].mxu1 }
 0xa01   :  { %v4100_v40 = vpop.f32.mrb[40].mxu0  ;;  %v4102_v41 = vpop.f32.mrb[56].mxu1 }
 0xa02   :  { %v3108_v27 = vpop.f32.mrb[41].mxu0  ;;  %v3114_v42 = vpop.f32.mrb[57].mxu1  ;;  %v2008_v43 = vsel %vm1218_vm4, %v4100_v40, -inf  ;;  %v2011_v38 = vsel %vm1218_vm4, %v4102_v41, -inf }
 0xa03   :  { %2009 = vmax.xlane.f32.xlu0 %v2008_v43  ;;  %v1769_v32 = vpop.f32.mrb[42].mxu0  ;;  %v1815_v44 = vpop.f32.mrb[58].mxu1 }
 0xa04   :  { %v3109_v37 = vpop.f32.mrb[43].mxu0  ;;  %v3115_v47 = vpop.f32.mrb[59].mxu1 }
 0xa07   :  { %2012 = vmax.xlane.f32.xlu0 %v2011_v38 }
 0xa09   :  { %v1858_v49 = vpop.f32.mrb[44].mxu0 }
 0xa0a   :  { %v3120_v50 = vpop.f32.mrb[45].mxu0  ;;  %v2014_v20 = vsel %vm1218_vm4, %v1858_v49, -inf }
 0xa0b   :  { %v1861_v48 = vpop.f32.mrb[46].mxu0  ;;  %2015 = vmax.xlane.f32.xlu1 %v2014_v20 }
 0xa0c   :  { %v3121_v13 = vpop.f32.mrb[47].mxu0 }
 0xa0d   :  { %v4109_v52 = vpop.f32.mrb[60].mxu1 }
 0xa0e   :  { %v3126_v53 = vpop.f32.mrb[61].mxu1  ;;  %v2017_v54 = vsel %vm1218_vm4, %v4109_v52, -inf }
 0xa0f   :  { %2018 = vmax.xlane.f32.xlu0 %v2017_v54  ;;  %v1907_v56 = vpop.f32.mrb[62].mxu1 }
 0xa10   :  { %v3127_v55 = vpop.f32.mrb[63].mxu1 }
 0xa11   :  { %v4113_v57 = vpop.f32.mrb[48].mxu0 }
 0xa12   :  { %v3132_v58 = vpop.f32.mrb[49].mxu0  ;;  %v2020_v59 = vsel %vm1218_vm4, %v4113_v57, -inf }
 0xa13   :  { %v1953_v60 = vpop.f32.mrb[50].mxu0  ;;  %2021 = vmax.xlane.f32.xlu1 %v2020_v59 }
 0xa14   :  { %v3133_v61 = vpop.f32.mrb[51].mxu0 }
 0xa15   :  { %v4117_v62 = vpop.f32.mrb[64].mxu1 }
 0xa16   :  { %v3138_v3 = vpop.f32.mrb[65].mxu1  ;;  %v2023_v44 = vsel %vm1218_vm4, %v4117_v62, -inf }
 0xa17   :  { %v1999_v6 = vpop.f32.mrb[66].mxu1 }
 0xa18   :  { %v3139_v4 = vpop.f32.mrb[67].mxu1 }
 0xa1a   :  { %v2007_v7 = vpop.xlane.xlu1 %2006 }
 0xa1b   :  { %v2027_v35 = vsub.f32 %v4096_v23, %v2007_v7 }
 0xa1d   :  { %v2036_v36 = vmul.f32 1.442695, %v2027_v35 }
 0xa24   :  { %1460 = vrot.lane.b32.xlu1 %v3989_v22, %s3604_s15 }
 0xa98   :  { %v2016_v8 = vpop.xlane.xlu1 %2015 }
 0xa99   :  { %v2030_v9 = vsub.f32 %v1858_v49, %v2016_v8 }
 0xa9b   :  { %v2042_v1 = vmul.f32 1.442695, %v2030_v9 }
 0xa9d   :  { %3442 = vpow2.f32 %v2042_v1 }
 0xaa0   :  { %v2022_v10 = vpop.xlane.xlu1 %2021 }
 0xaa1   :  { %v2032_v15 = vsub.f32 %v4113_v57, %v2022_v10 }
 0xaa3   :  { %v2046_v13 = vmul.f32 1.442695, %v2032_v15 }
 0xaa4   :  { %v1461_v2 = vpop.permute.xlu1 %1460 }
 0xaa5   :  { %v1504_v16 = vadd.f32 %v4056_v29, %v1461_v2  ;;  %v1512_v17 = vadd.f32 %v4054_v25, %v1461_v2  ;;  %v1507_v18 = vadd.f32 %v4060_v31, %v1461_v2  ;;  %v1515_v19 = vadd.f32 %v4058_v30, %v1461_v2  ;;  %v2004_v25 = vpop.xlane.xlu0 %2003 }
 0xaa6   :  { %v2026_v29 = vsub.f32 %v4092_v24, %v2004_v25 }
 0xaa7   :  { %v4126_v26 = vpop.eup %3442  ;;  %v2098_v22 = vpack.c.bf16 %v1507_v18, %v1504_v16  ;;  %v3347_v14 = vpack.i.bf16 %v1507_v18, %v1504_v16  ;;  %v2099_v33 = vpack.c.bf16 %v1515_v19, %v1512_v17  ;;  %v4130_v34 = vpack.i.bf16 %v1515_v19, %v1512_v17 }
 0xaa8   :  { %v2062_v28 = vsel %vm1218_vm4, %v4126_v26, 0.0  ;;  %v2034_v31 = vmul.f32 1.442695, %v2026_v29 }
 0xaa9   :  { %2063 = vadd.xlane.f32.xlu1 %v2062_v28  ;;  %3141 = vmatpush3.bf16.msra.mxu0 %v2098_v22  ;;  %v2010_v30 = vpop.xlane.xlu0 %2009 }
 0xaaa   :  { %3147 = vmatpush3.bf16.msra.mxu1 %v2099_v33  ;;  %3348 = vrot.lane.b32.xlu0 %v3347_v14, %s3614_s17  ;;  %3444 = vpow2.f32 %v2034_v31  ;;  %v2028_v39 = vsub.f32 %v4100_v40, %v2010_v30 }
 0xaab   :  { %3152 = vmatprep.subr.bf16.mxu0 %v3611_v0  ;;  %3158 = vmatprep.subr.bf16.mxu1 %v3611_v0  ;;  %3446 = vpow2.f32 %v2036_v36 }
 0xaac   :  { %v2038_v42 = vmul.f32 1.442695, %v2028_v39 }
 0xaad   :  { %v2013_v27 = vpop.xlane.xlu0 %2012 }
 0xaae   :  { %3353 = vrot.lane.b32.xlu0 %v4130_v34, %s3614_s17  ;;  %v2029_v43 = vsub.f32 %v4102_v41, %v2013_v27  ;;  %3448 = vpow2.f32 %v2038_v42 }
 0xab0   :  { %v2040_v32 = vmul.f32 1.442695, %v2029_v43 }
 0xab1   :  { %v2019_v50 = vpop.xlane.xlu0 %2018 }
 0xab2   :  { %3450 = vpow2.f32 %v2040_v32  ;;  %v2031_v20 = vsub.f32 %v4109_v52, %v2019_v50 }
 0xab4   :  { %v3445_v37 = vpop.eup %3444  ;;  %v2044_v48 = vmul.f32 1.442695, %v2031_v20 }
 0xab5   :  { %v2050_v24 = vsel %vm1218_vm4, %v3445_v37, 0.0  ;;  %v3447_v23 = vpop.eup %3446 }
 0xab6   :  { %v2053_v47 = vsel %vm1218_vm4, %v3447_v23, 0.0  ;;  %3452 = vpow2.f32 %v2044_v48 }
 0xab7   :  { %3454 = vpow2.f32 %v2046_v13 }
 0xab8   :  { %v3449_v40 = vpop.eup %3448 }
 0xab9   :  { %v2056_v38 = vsel %vm1218_vm4, %v3449_v40, 0.0 }
 0xaba   :  { %3358 = vrot.lane.b32.xlu1 %v3347_v14, %s3615_s18 }
 0xabc   :  { %v4147_v49 = vpop.eup %3450 }
 0xabd   :  { %v2059_v41 = vsel %vm1218_vm4, %v4147_v49, 0.0 }
 0xac0   :  { %v4155_v53 = vpop.eup %3452 }
 0xac1   :  { %v2065_v54 = vsel %vm1218_vm4, %v4155_v53, 0.0  ;;  %v4159_v56 = vpop.eup %3454 }
 0xac2   :  { %v2068_v55 = vsel %vm1218_vm4, %v4159_v56, 0.0 }
 0xacd   :  { %2024 = vmax.xlane.f32.xlu0 %v2023_v44 }
 0xad1   :  { %2051 = vadd.xlane.f32.xlu0 %v2050_v24 }
 0xad5   :  { %2054 = vadd.xlane.f32.xlu0 %v2053_v47 }
 0xad9   :  { %2057 = vadd.xlane.f32.xlu0 %v2056_v38 }
 0xadd   :  { %2060 = vadd.xlane.f32.xlu0 %v2059_v41 }
 0xaf3   :  { %3363 = vrot.lane.b32.xlu0 %v4130_v34, %s3615_s18 }
 0xaf7   :  { %3368 = vrot.lane.b32.xlu0 %v3347_v14, %s3613_s0 }
 0xb16   :  { %2066 = vadd.xlane.f32.xlu0 %v2065_v54 }
 0xb1a   :  { %2069 = vadd.xlane.f32.xlu0 %v2068_v55 }
 0xb1c   :  { %v3349_v57 = vpop.permute.xlu0 %3348 }
 0xb1d   :  { %v3351_v9 = vunpack.i.h.bf16 %v3349_v57  ;;  %v3350_v1 = vunpack.i.l.bf16 %v3349_v57 }
 0xb1f   :  { %v2100_v19 = vpack.c.bf16 %v3351_v9, %v3350_v1 }
 0xb20   :  { %v3354_v58 = vpop.permute.xlu0 %3353 }
 0xb21   :  { %v3356_v16 = vunpack.i.h.bf16 %v3354_v58  ;;  %v3355_v17 = vunpack.i.l.bf16 %v3354_v58 }
 0xb23   :  { %v2101_v25 = vpack.c.bf16 %v3356_v16, %v3355_v17 }
 0xb36   :  { %v2064_v7 = vpop.xlane.xlu1 %2063 }
 0xb3a   :  { %v3359_v14 = vpop.permute.xlu1 %3358 }
 0xb3b   :  { %v3361_v30 = vunpack.i.h.bf16 %v3359_v14  ;;  %v3360_v31 = vunpack.i.l.bf16 %v3359_v14 }
 0xb3d   :  { %v2102_v32 = vpack.c.bf16 %v3361_v30, %v3360_v31 }
 0xb5a   :  { %v2025_v59 = vpop.xlane.xlu0 %2024 }
 0xb5b   :  { %v2033_v52 = vsub.f32 %v4117_v62, %v2025_v59 }
 0xb5d   :  { %v2048_v60 = vmul.f32 1.442695, %v2033_v52 }
 0xb5e   :  { %v2052_v61 = vpop.xlane.xlu0 %2051 }
 0xb5f   :  { %3456 = vpow2.f32 %v2048_v60 }
 0xb60   :  { %3458 = vrcp.f32 %v2052_v61 }
 0xb62   :  { %v2055_v3 = vpop.xlane.xlu0 %2054 }
 0xb63   :  { %3460 = vrcp.f32 %v2055_v3 }
 0xb66   :  { %v2058_v6 = vpop.xlane.xlu0 %2057 }
 0xb67   :  { %3462 = vrcp.f32 %v2058_v6 }
 0xb69   :  { %v4164_v4 = vpop.eup %3456 }
 0xb6a   :  { %v3459_v8 = vpop.eup %3458  ;;  %v2061_v10 = vpop.xlane.xlu0 %2060  ;;  %v2071_v15 = vsel %vm1218_vm4, %v4164_v4, 0.0 }
 0xb6b   :  { %v2082_v2 = vmul.f32 %v3459_v8, %v3445_v37  ;;  %3464 = vrcp.f32 %v2061_v10  ;;  %2072 = vadd.xlane.f32.xlu0 %v2071_v15 }
 0xb6c   :  { %3466 = vrcp.f32 %v2064_v7 }
 0xb6d   :  { %v3461_v62 = vpop.eup %3460  ;;  %v2090_v18 = vpack.c.bf16 %v2082_v2, %v2082_v2 }
 0xb6e   :  { %v2083_v22 = vmul.f32 %v3461_v62, %v3447_v23  ;;  %v3364_v29 = vpop.permute.xlu0 %3363 }
 0xb6f   :  { %3143 = vmatmul.mubr.msk.bf16.vlgmr.msra.gmra.mrb[52].mxu0 %vm1218_vm4, %v2090_v18  ;;  %v3366_v27 = vunpack.i.h.bf16 %v3364_v29  ;;  %v3365_v42 = vunpack.i.l.bf16 %v3364_v29 }
 0xb70   :  { %3153 = vmatpush3.bf16.msra.mxu0 %v2100_v19  ;;  %v2091_v28 = vpack.c.bf16 %v2083_v22, %v2083_v22  ;;  %3154 = vmatprep.mubr.msk.bf16.mxu0 %vm3612_vm0, %v3611_v0 }
 0xb71   :  { %v3463_v33 = vpop.eup %3462  ;;  %3164 = vmatprep.subr.bf16.mxu0 %v3611_v0  ;;  %v2103_v47 = vpack.c.bf16 %v3366_v27, %v3365_v42 }
 0xb72   :  { %v2084_v35 = vmul.f32 %v3463_v33, %v3449_v40  ;;  %3149 = vmatmul.mubr.msk.bf16.vlgmr.msra.gmra.mrb[68].mxu1 %vm1218_vm4, %v2091_v28  ;;  %v3369_v37 = vpop.permute.xlu0 %3368 }
 0xb73   :  { %3159 = vmatpush3.bf16.msra.mxu1 %v2101_v25  ;;  %3160 = vmatprep.mubr.msk.bf16.mxu1 %vm3612_vm0, %v3611_v0  ;;  %v3371_v40 = vunpack.i.h.bf16 %v3369_v37  ;;  %v3370_v38 = vunpack.i.l.bf16 %v3369_v37 }
 0xb74   :  { %v2092_v36 = vpack.c.bf16 %v2084_v35, %v2084_v35  ;;  %3170 = vmatprep.subr.bf16.mxu1 %v3611_v0 }
 0xb75   :  { %v3465_v39 = vpop.eup %3464  ;;  %v2104_v41 = vpack.c.bf16 %v3371_v40, %v3370_v38 }
 0xb76   :  { %v3467_v43 = vpop.eup %3466  ;;  %v2085_v44 = vmul.f32 %v3465_v39, %v4147_v49 }
 0xb77   :  { %3155 = vmatmul.mubr.msk.bf16.vlgmr.msra.gmra.mrb[56].mxu0 %vm1218_vm4, %v2092_v36  ;;  %v2086_v23 = vmul.f32 %v3467_v43, %v4126_v26 }
 0xb78   :  { %3165 = vmatpush3.bf16.msra.mxu0 %v2102_v32  ;;  %v2093_v24 = vpack.c.bf16 %v2085_v44, %v2085_v44  ;;  %3166 = vmatprep.mubr.msk.bf16.mxu0 %vm3612_vm0, %v3611_v0 }
 0xb79   :  { %3176 = vmatprep.subr.bf16.mxu0 %v3611_v0  ;;  %v2094_v49 = vpack.c.bf16 %v2086_v23, %v2086_v23 }
 0xb7a   :  { %3161 = vmatmul.mubr.msk.bf16.vlgmr.msra.gmra.mrb[72].mxu1 %vm1218_vm4, %v2093_v24 }
 0xb7b   :  { %3171 = vmatpush3.bf16.msra.mxu1 %v2103_v47  ;;  %3172 = vmatprep.mubr.msk.bf16.mxu1 %vm3612_vm0, %v3611_v0 }
 0xb7c   :  { %3182 = vmatprep.subr.bf16.mxu1 %v3611_v0 }
 0xb7f   :  { %3167 = vmatmul.mubr.msk.bf16.vlgmr.msra.gmra.mrb[60].mxu0 %vm1218_vm4, %v2094_v49 }
 0xb80   :  { %3177 = vmatpush3.bf16.msra.mxu0 %v2104_v41  ;;  %3178 = vmatprep.mubr.msk.bf16.mxu0 %vm3612_vm0, %v3611_v0 }
 0xb81   :  { %3373 = vrot.lane.b32.xlu0 %v4130_v34, %s3613_s0  ;;  %3188 = vmatprep.subr.bf16.mxu0 %v3611_v0 }
 0xb85   :  { %2485 = vrot.lane.b32.xlu0 %v3963_v63, %s3617_s21 }
 0xba3   :  { %v2067_v26 = vpop.xlane.xlu0 %2066 }
 0xba4   :  { %3468 = vrcp.f32 %v2067_v26 }
 0xba7   :  { %v2070_v50 = vpop.xlane.xlu0 %2069 }
 0xba8   :  { %3470 = vrcp.f32 %v2070_v50 }
 0xbae   :  { %v3469_v20 = vpop.eup %3468 }
 0xbaf   :  { %v2087_v48 = vmul.f32 %v3469_v20, %v4155_v53 }
 0xbb1   :  { %v2095_v13 = vpack.c.bf16 %v2087_v48, %v2087_v48 }
 0xbb2   :  { %v3471_v54 = vpop.eup %3470 }
 0xbb3   :  { %v2088_v55 = vmul.f32 %v3471_v54, %v4159_v56  ;;  %3173 = vmatmul.mubr.msk.bf16.vlgmr.msra.gmra.mrb[76].mxu1 %vm1218_vm4, %v2095_v13 }
 0xbb4   :  { %3184 = vmatprep.mubr.msk.bf16.mxu1 %vm3612_vm0, %v3611_v0 }
 0xbb5   :  { %v2096_v34 = vpack.c.bf16 %v2088_v55, %v2088_v55 }
 0xbb7   :  { %3179 = vmatmul.mubr.msk.bf16.vlgmr.msra.gmra.mrb[64].mxu0 %vm1218_vm4, %v2096_v34 }
 0xbb8   :  { %3192 = vmatprep.mubr.msk.bf16.mxu0 %vm3612_vm0, %v3611_v0 }
 0xbf8   :  { %v2073_v63 = vpop.xlane.xlu0 %2072 }
 0xbf9   :  { %3472 = vrcp.f32 %v2073_v63 }
 0xbfc   :  { %v3374_v57 = vpop.permute.xlu0 %3373 }
 0xbfd   :  { %v3376_v58 = vunpack.i.h.bf16 %v3374_v57  ;;  %v3375_v53 = vunpack.i.l.bf16 %v3374_v57 }
 0xbff   :  { %v2105_v59 = vpack.c.bf16 %v3376_v58, %v3375_v53 }
 0xc00   :  { %v2486_v29 = vpop.permute.xlu0 %2485 }
 0xc01   :  { %3183 = vmatpush3.bf16.msra.mxu1 %v2105_v59  ;;  %3189 = vmatpush3.bf16.msra.mxu0 %v2486_v29  ;;  %v2483_v59 = vsub.s32 3, %v3762_v11  ;;  %v3400_v29 = vld [vmem:[%s4314_s7 + $0x10] sm:$0xff]  }
 0xc02   :  { %3196 = vmatprep.subr.bf16.mxu1 %v3611_v0  ;;  %3190 = vmatprep.subr.bf16.mxu0 %v3611_v0 }
 0xc03   :  { %v3473_v56 = vpop.eup %3472 }
 0xc04   :  { %v2089_v52 = vmul.f32 %v3473_v56, %v4164_v4  ;;  %v4224_v56 = vld [vmem:[#allocation7] sm:$0xff] }
 0xc06   :  { %v2097_v60 = vpack.c.bf16 %v2089_v52, %v2089_v52  ;;  %v2484_v52 = vrot.slane %v4224_v56, %v2483_v59 }
 0xc08   :  { %3185 = vmatmul.mubr.msk.bf16.vlgmr.msra.gmra.mrb[80].mxu1 %vm1218_vm4, %v2097_v60 }
 0xc09   :  { %3200 = vmatprep.mubr.msk.bf16.mxu1 %vm3612_vm0, %v3611_v0 }
 0xc42   :  { %v2143_v61 = vpop.f32.mrb[52].mxu0 }
 0xc43   :  { %v3144_v3 = vpop.f32.mrb[53].mxu0 }
 0xc44   :  { %v2146_v6 = vpop.f32.mrb[54].mxu0 }
 0xc45   :  { %v3145_v7 = vpop.f32.mrb[55].mxu0  ;;  %v2186_v8 = vpop.f32.mrb[68].mxu1 }
 0xc46   :  { %v3150_v9 = vpop.f32.mrb[69].mxu1 }
 0xc47   :  { %v2189_v1 = vpop.f32.mrb[70].mxu1 }
 0xc48   :  { %v3151_v10 = vpop.f32.mrb[71].mxu1 }
 0xc4a   :  { %v2229_v15 = vpop.f32.mrb[56].mxu0 }
 0xc4b   :  { %v3156_v2 = vpop.f32.mrb[57].mxu0 }
 0xc4c   :  { %v2232_v62 = vpop.f32.mrb[58].mxu0 }
 0xc4d   :  { %v3157_v16 = vpop.f32.mrb[59].mxu0  ;;  %v2272_v17 = vpop.f32.mrb[72].mxu1 }
 0xc4e   :  { %v3377_v4 = vpack.i.bf16 %v2272_v17, %v2229_v15  ;;  %v3162_v18 = vpop.f32.mrb[73].mxu1 }
 0xc4f   :  { %v2275_v19 = vpop.f32.mrb[74].mxu1 }
 0xc50   :  { %3378 = vrot.lane.b32.xlu1 %v3377_v4, %s3608_s28  ;;  %v3163_v22 = vpop.f32.mrb[75].mxu1 }
 0xc52   :  { %v2315_v14 = vpop.f32.mrb[60].mxu0 }
 0xc53   :  { %v3168_v28 = vpop.f32.mrb[61].mxu0 }
 0xc54   :  { %v2318_v33 = vpop.f32.mrb[62].mxu0  ;;  %v3397_v28 = vld [vmem:[#allocation8 + $0x8] sm:$0xff]  }
 0xc55   :  { %v3169_v25 = vpop.f32.mrb[63].mxu0  ;;  %v3398_v33 = vld [vmem:[%s4314_s7] sm:$0xff]  }
 0xc56   :  { %v3399_v25 = vld [vmem:[%s4314_s7 + $0x8] sm:$0xff]  }
 0xc86   :  { %v2358_v30 = vpop.f32.mrb[76].mxu1 }
 0xc87   :  { %v3382_v31 = vpack.i.bf16 %v2358_v30, %v2315_v14  ;;  %v3174_v35 = vpop.f32.mrb[77].mxu1  ;;  %v3401_v30 = vld [vmem:[%s4314_s7 + $0x18] sm:$0xff]  }
 0xc88   :  { %v2361_v36 = vpop.f32.mrb[78].mxu1  ;;  %v3403_v35 = vld [vmem:[%s4314_s7 + $0x28] sm:$0xff]  }
 0xc89   :  { %3383 = vrot.lane.b32.xlu0 %v3382_v31, %s3618_s22  ;;  %v3175_v39 = vpop.f32.mrb[79].mxu1  ;;  %v3402_v31 = vld [vmem:[%s4314_s7 + $0x20] sm:$0xff]  }
 0xc8a   :  { %v2401_v27 = vpop.f32.mrb[64].mxu0 }
 0xc8b   :  { %v3180_v42 = vpop.f32.mrb[65].mxu0 }
 0xc8c   :  { %v2404_v43 = vpop.f32.mrb[66].mxu0 }
 0xc8d   :  { %v3181_v32 = vpop.f32.mrb[67].mxu0  ;;  %2487 = vrot.lane.b32.xlu0 %v3969_v5, %s3617_s21 }
 0xcc2   :  { %v3379_v40 = vpop.permute.xlu1 %3378 }
 0xcc3   :  { %v3381_v38 = vunpack.i.h.bf16 %v3379_v40  ;;  %v3380_v49 = vunpack.i.l.bf16 %v3379_v40 }
 0xcc5   :  { %v2475_v20 = vsel %vm329_vm2, %v2186_v8, %v3381_v38  ;;  %v2474_v48 = vsel %vm329_vm2, %v2143_v61, %v3380_v49 }
 0xcdb   :  { %v2444_v44 = vpop.f32.mrb[80].mxu1 }
 0xcdc   :  { %v3387_v37 = vpack.i.bf16 %v2444_v44, %v2401_v27  ;;  %v3186_v24 = vpop.f32.mrb[81].mxu1  ;;  %v2565_v44 = vsub.s32 7, %v3762_v11 }
 0xcdd   :  { %v2447_v23 = vpop.f32.mrb[82].mxu1 }
 0xcde   :  { %3388 = vrot.lane.b32.xlu1 %v3387_v37, %s3619_s23  ;;  %v3187_v47 = vpop.f32.mrb[83].mxu1  ;;  %v2566_v37 = vrot.slane %v4224_v56, %v2565_v44  ;;  %v4262_v23 = vld [vmem:[#allocation7 + $0x8] sm:$0xf] }
 0xcdf   :  { %v2572_v38 = vrot.slane %v4262_v23, %v134_v12  ;;  %v2579_v12 = vrot.slane %v4262_v23, %v2483_v59 }
 0xcfb   :  { %v3384_v41 = vpop.permute.xlu0 %3383 }
 0xcfc   :  { %v3386_v26 = vunpack.i.h.bf16 %v3384_v41  ;;  %v3385_v50 = vunpack.i.l.bf16 %v3384_v41 }
 0xcfe   :  { %v2477_v13 = vsel %vm1218_vm4, %v2475_v20, %v3386_v26  ;;  %v2476_v5 = vsel %vm1218_vm4, %v2474_v48, %v3385_v50 }
 0xcff   :  { %v2488_v54 = vpop.permute.xlu0 %2487 }
 0xd00   :  { %3191 = vmatpush3.bf16.msra.mxu0 %v2488_v54 }
 0xd01   :  { %3204 = vmatprep.subr.bf16.mxu0 %v3611_v0 }
 0xd50   :  { %v3389_v55 = vpop.permute.xlu1 %3388 }
 0xd51   :  { %v3391_v34 = vunpack.i.h.bf16 %v3389_v55  ;;  %v3390_v63 = vunpack.i.l.bf16 %v3389_v55 }
 0xd53   :  { %v2479_v57 = vsel %vm1221_vm5, %v2477_v13, %v3391_v34  ;;  %v2478_v58 = vsel %vm1221_vm5, %v2476_v5, %v3390_v63  ;;  %v3404_v13 = vld [vmem:[%s4314_s7 + $0x30] sm:$0xff]   ;;  %v3405_v5 = vld [vmem:[%s4314_s7 + $0x38] sm:$0xff]   ;;  %s3620_s7 = smov [#allocation10]  }
 0xd54   :  { %v2480_v53 = vpack.c.bf16 %v2479_v57, %v2478_v58  ;;  %s2779_s27 = sshll.u32 %s3620_s7, 4  ;;  %s2780_s27 = int_to_ptr.vmem [resolvable:$true] %s2779_s27 }
 0xd55   :  { %s3573_s29 = scalar_lea.vmem %s2780_s27, 256  ;;  %p3578_p5 = scmp.lt.s32.totalorder %s2780_s27, %s2780_s27 }
 0xd56   :  { %3193 = vmatmul.mubr.msk.bf16.vlgmr.msra.gmra.mrb[68].mxu0 %vm148_vm1, %v2480_v53  ;;  %p3574_p4 = scmp.ne.s32.totalorder %s2780_s27, %s3573_s29  ;;  %p3579_p6 = scmp.lt.s32.totalorder %s3573_s29, %s3573_s29 }
 0xd57   :  { %3220 = vmatprep.mubr.msk.bf16.mxu0 %vm3612_vm0, %v3611_v0  ;;  %3205 = vmatpush3.bf16.msra.mxu0 %v3398_v33 }
 0xd58   :  { %3206 = vmatprep.subr.bf16.mxu0 %v3611_v0  ;;  %p3580_p7 = por %p3579_p6, %p3578_p5 }
 0xd5a   :  { %p3581_p8 = pnand %p3580_p7, %p3574_p4 }
 0xd5b   :  { %3207 = vmatpush3.bf16.msra.mxu0 %v3399_v25 }
 0xd5c   :  { %3208 = vmatprep.subr.bf16.mxu0 %v3611_v0 }
 0xd5f   :  { %3209 = vmatpush3.bf16.msra.mxu0 %v3400_v29 }
 0xd60   :  { %3210 = vmatprep.subr.bf16.mxu0 %v3611_v0 }
 0xd63   :  { %3211 = vmatpush3.bf16.msra.mxu0 %v3401_v30 }
 0xd64   :  { %3212 = vmatprep.subr.bf16.mxu0 %v3611_v0 }
 0xd67   :  { %3213 = vmatpush3.bf16.msra.mxu0 %v3402_v31  ;;  %v2763_v31 = vrot.slane %v4262_v23, %v1325_v21 }
 0xd68   :  { %3214 = vmatprep.subr.bf16.mxu0 %v3611_v0 }
 0xd6b   :  { %3215 = vmatpush3.bf16.msra.mxu0 %v3403_v35 }
 0xd6c   :  { %3216 = vmatprep.subr.bf16.mxu0 %v3611_v0 }
 0xd6f   :  { %3217 = vmatpush3.bf16.msra.mxu0 %v3404_v13 }
 0xd70   :  { %3218 = vmatprep.subr.bf16.mxu0 %v3611_v0 }
 0xd73   :  { %3219 = vmatpush3.bf16.msra.mxu0 %v3405_v5 }
 0xe29   :  { %v2528_v60 = vpop.f32.mrb[68].mxu0 }
 0xe2a   :  { %v2529_v61 = vadd.f32 %v2528_v60, %v2484_v52  ;;  %v3194_v3 = vpop.f32.mrb[69].mxu0 }
 0xe2b   :  { %v2531_v6 = vpop.f32.mrb[70].mxu0 }
 0xe2c   :  { %v2532_v7 = vadd.f32 %v2531_v6, %v2484_v52  ;;  %v3195_v8 = vpop.f32.mrb[71].mxu0  ;;  %v2535_v9 = vadd.f32 %v2529_v61, %v4009_v45 }
 0xe2e   :  { %v2536_v1 = vadd.f32 %v2532_v7, %v4011_v46  ;;  %v2537_v10 = vsel %vm148_vm1, %v2535_v9, 0.0  ;;  %v3396_v46 = vld [vmem:[#allocation8] sm:$0xff]  }
 0xe2f   :  { %2538 = vadd.xlane.f32.xlu1 %v2537_v10  ;;  %3197 = vmatpush3.bf16.msra.mxu1 %v3396_v46 }
 0xe30   :  { %v2540_v15 = vsel %vm148_vm1, %v2536_v1, 0.0  ;;  %3198 = vmatprep.subr.bf16.mxu1 %v3611_v0  ;;  %v2641_v0 = vsub.s32 4, %v3762_v11 }
 0xe31   :  { %2541 = vadd.xlane.f32.xlu0 %v2540_v15 }
 0xe32   :  { %v2642_v61 = vrot.slane %v4224_v56, %v2641_v0 }
 0xe33   :  { %3199 = vmatpush3.bf16.msra.mxu1 %v3397_v28 }
 0xebc   :  { %v2539_v2 = vpop.xlane.xlu1 %2538 }
 0xebd   :  { %v2543_v62 = vmul.f32 0.03125, %v2539_v2 }
 0xebe   :  { %v2542_v16 = vpop.xlane.xlu0 %2541 }
 0xebf   :  { %v2545_v17 = vsub.f32 %v2535_v9, %v2543_v62  ;;  %v2544_v4 = vmul.f32 0.03125, %v2542_v16 }
 0xec1   :  { %v2546_v18 = vsub.f32 %v2536_v1, %v2544_v4  ;;  %v2547_v19 = vmul.f32 %v2545_v17, %v2545_v17 }
 0xec3   :  { %v2549_v22 = vsel %vm148_vm1, %v2547_v19, 0.0  ;;  %v2548_v14 = vmul.f32 %v2546_v18, %v2546_v18 }
 0xec4   :  { %2550 = vadd.xlane.f32.xlu0 %v2549_v22 }
 0xec5   :  { %v2552_v45 = vsel %vm148_vm1, %v2548_v14, 0.0 }
 0xec6   :  { %2553 = vadd.xlane.f32.xlu1 %v2552_v45 }
 0xf51   :  { %v2551_v36 = vpop.xlane.xlu0 %2550 }
 0xf52   :  { %v2555_v39 = vmul.f32 0.03125, %v2551_v36  ;;  %v2769_v36 = vrot.slane %v4262_v23, %v1227_v51 }
 0xf53   :  { %v2554_v27 = vpop.xlane.xlu1 %2553 }
 0xf54   :  { %v2557_v42 = vadd.f32 1e-05, %v2555_v39  ;;  %v2556_v43 = vmul.f32 0.03125, %v2554_v27 }
 0xf56   :  { %3474 = vrsqrt.f32 %v2557_v42  ;;  %v2558_v32 = vadd.f32 1e-05, %v2556_v43 }
 0xf58   :  { %3476 = vrsqrt.f32 %v2558_v32 }
 0xf60   :  { %v3475_v24 = vpop.eup %3474 }
 0xf61   :  { %v2561_v47 = vmul.f32 %v3475_v24, %v2545_v17 }
 0xf62   :  { %v3477_v40 = vpop.eup %3476 }
 0xf63   :  { %v2567_v49 = vmul.f32 %v2566_v37, %v2561_v47  ;;  %v2562_v41 = vmul.f32 %v3477_v40, %v2546_v18 }
 0xf65   :  { %v2568_v26 = vmul.f32 %v2566_v37, %v2562_v41  ;;  %v2573_v50 = vadd.f32 %v2572_v38, %v2567_v49 }
 0xf67   :  { %v2574_v20 = vadd.f32 %v2572_v38, %v2568_v26 }
 0xf69   :  { %v2575_v48 = vpack.c.bf16 %v2574_v20, %v2573_v50 }
 0xf6b   :  { %3201 = vmatmul.mubr.msk.bf16.vlgmr.msra.gmra.mrb[84].mxu1 %vm148_vm1, %v2575_v48 }
0x103e   :  { %v2629_v54 = vpop.f32.mrb[84].mxu1 }
0x103f   :  { %v2630_v55 = vadd.f32 %v2629_v54, %v2579_v12  ;;  %v3202_v34 = vpop.f32.mrb[85].mxu1 }
0x1040   :  { %v2632_v63 = vpop.f32.mrb[86].mxu1 }
0x1041   :  { %v2633_v57 = vadd.f32 %v2632_v63, %v2579_v12  ;;  %v3203_v58 = vpop.f32.mrb[87].mxu1  ;;  %v2636_v53 = vmax.f32 %v2630_v55, 0.0 }
0x1043   :  { %v2637_v52 = vmax.f32 %v2633_v57, 0.0 }
0x1045   :  { %v2638_v60 = vpack.c.bf16 %v2637_v52, %v2636_v53 }
0x1047   :  { %3221 = vmatmul.mubr.bf16.vlgmr.msra.gmra.mrb[72].mxu0 %v2638_v60 }
0x111a   :  { %v2725_v3 = vpop.f32.mrb[72].mxu0 }
0x111b   :  { %v2726_v6 = vadd.f32 %v2725_v3, %v2642_v61  ;;  %v3222_v7 = vpop.f32.mrb[73].mxu0 }
0x111c   :  { %v2728_v8 = vpop.f32.mrb[74].mxu0 }
0x111d   :  { %v2732_v9 = vadd.f32 %v2726_v6, %v2573_v50  ;;  %v2729_v59 = vadd.f32 %v2728_v8, %v2642_v61  ;;  %v3223_v1 = vpop.f32.mrb[75].mxu0 }
0x111f   :  { %v2734_v10 = vsel %vm148_vm1, %v2732_v9, 0.0  ;;  %v2733_v15 = vadd.f32 %v2729_v59, %v2574_v20 }
0x1120   :  { %2735 = vadd.xlane.f32.xlu0 %v2734_v10 }
0x1121   :  { %v2737_v2 = vsel %vm148_vm1, %v2733_v15, 0.0 }
0x1122   :  { %2738 = vadd.xlane.f32.xlu1 %v2737_v2 }
0x11ad   :  { %v2736_v62 = vpop.xlane.xlu0 %2735 }
0x11ae   :  { %v2740_v16 = vmul.f32 0.03125, %v2736_v62 }
0x11af   :  { %v2739_v17 = vpop.xlane.xlu1 %2738 }
0x11b0   :  { %v2742_v4 = vsub.f32 %v2732_v9, %v2740_v16  ;;  %v2741_v18 = vmul.f32 0.03125, %v2739_v17 }
0x11b2   :  { %v2743_v56 = vsub.f32 %v2733_v15, %v2741_v18  ;;  %v2744_v19 = vmul.f32 %v2742_v4, %v2742_v4 }
0x11b4   :  { %v2746_v22 = vsel %vm148_vm1, %v2744_v19, 0.0  ;;  %v2745_v14 = vmul.f32 %v2743_v56, %v2743_v56 }
0x11b5   :  { %2747 = vadd.xlane.f32.xlu0 %v2746_v22 }
0x11b6   :  { %v2749_v45 = vsel %vm148_vm1, %v2745_v14, 0.0 }
0x11b7   :  { %2750 = vadd.xlane.f32.xlu1 %v2749_v45 }
0x1242   :  { %v2748_v46 = vpop.xlane.xlu0 %2747 }
0x1243   :  { %v2752_v28 = vmul.f32 0.03125, %v2748_v46 }
0x1244   :  { %v2751_v33 = vpop.xlane.xlu1 %2750 }
0x1245   :  { %v2754_v25 = vadd.f32 1e-05, %v2752_v28  ;;  %v2753_v29 = vmul.f32 0.03125, %v2751_v33 }
0x1247   :  { %3478 = vrsqrt.f32 %v2754_v25  ;;  %v2755_v30 = vadd.f32 1e-05, %v2753_v29 }
0x1249   :  { %3480 = vrsqrt.f32 %v2755_v30 }
0x1251   :  { %v3479_v35 = vpop.eup %3478 }
0x1252   :  { %v2758_v39 = vmul.f32 %v3479_v35, %v2742_v4 }
0x1253   :  { %v3481_v27 = vpop.eup %3480 }
0x1254   :  { %v2759_v42 = vmul.f32 %v3481_v27, %v2743_v56  ;;  %v2764_v43 = vmul.f32 %v2763_v31, %v2758_v39 }
0x1256   :  { %v2765_v32 = vmul.f32 %v2763_v31, %v2759_v42  ;;  %v2770_v44 = vadd.f32 %v2769_v36, %v2764_v43 }
0x1258   :  { %v2771_v37 = vadd.f32 %v2769_v36, %v2765_v32  ;;  %2772 = vst.msk [vmem:[#allocation10] sm:$0xff] %vm148_vm1, %v2770_v44 }
0x125a   :  { %2773 = vst.msk [vmem:[#allocation10 + $0x8] sm:$0xff] %vm148_vm1, %v2771_v37 }
0x125b   :  { %3584 = shalt.err (!%p3581_p8)
}
0x125c   :  { %s3585_s9 = scalar_lea.hbm %s4315_s8, 256 }
0x125d   :  { %p3586_p9 = scmp.ne.s32.totalorder %s4315_s8, %s3585_s9  ;;  %p3589_p10 = scmp.lt.u32.totalorder %s3585_s9, %s4315_s8 }
0x125f   :  { %p3591_p11 = pnand %p3589_p10, %p3586_p9 }
0x1261   :  { %3594 = shalt.err (!%p3591_p11)
}
0x1262   :  { %2785 = dma.vmem_to_hbm [thread:$0]  %s2780_s27, 256, %s4315_s8, [#allocation4], %s3607_s4, %s3607_s4, %s3608_s28  }
0x1263   :  { %3601 = dma.done.wait [#allocation4], 256  }
0x1264   :  { %3602 = vsyncadd [#allocation4], 4294967040 }
0x1265   :  { %2789 = vsyncpa [#allocation3], 1 }
0x1266   :  { %2790 = vsyncpa [#allocation6], 1 }
0x1267   :  { %2791 = vsyncpa [#allocation9], 1 }
0x1268   :  { %2792 = vsyncpa [#allocation4], 1 }

</bundles_post_ra>
